<compile_context>
chip_gen: v6e
topology: v6e:2x2x1
jax: 0.10.0
libtpu: 0.0.40
codegen_flags: <defaults>
</compile_context>

<pallas_src>
import functools
import math

import jax
import jax.numpy as jnp
from jax import lax
from jax.experimental import pallas as pl
from jax.experimental.pallas import tpu as pltpu


def actor_kernel(obs_ref, laser_ref, h0_ref, c0_ref,
                 w_pre_ref, b_pre_ref,
                 w1_pre_ref, w1_obs_ref, b1_ref,
                 w_ih_ref, w_hh_ref, b_lstm_ref,
                 w3_ref, b3_ref,
                 out_ref, hT_ref, cT_ref,
                 *, T, H2P):
    f32 = jnp.float32

    def sigmoid(x):
        # Single EUP op (tanh) instead of exp + reciprocal.
        return 0.5 * jnp.tanh(0.5 * x) + 0.5

    # PreFC + relu: (T, laser_cnt) @ (laser_cnt, 10)
    pre = jnp.maximum(
        jnp.dot(laser_ref[...], w_pre_ref[...], preferred_element_type=f32)
        + b_pre_ref[...], 0.0)                                   # (T, 10)

    # FC1 on cat([pre, obs], 1) == pre @ W1_pre + obs @ W1_obs + b1
    # (W1 pre-split on the host -> no unaligned in-kernel row slice).
    x1 = jnp.maximum(
        jnp.dot(pre, w1_pre_ref[...], preferred_element_type=f32)
        + jnp.dot(obs_ref[...], w1_obs_ref[...], preferred_element_type=f32)
        + b1_ref[...], 0.0)                                      # (T, H1)

    # Input contribution to all LSTM gates for every timestep: one MXU matmul.
    # Kept as an SSA value (T x 4*H2P f32 = a handful of vregs), no VMEM scratch.
    gates_x = (jnp.dot(x1, w_ih_ref[...], preferred_element_type=f32)
               + b_lstm_ref[...])                                # (T, 4*H2P)

    w_hh = w_hh_ref[...]                                         # (H2P, 4*H2P)

    # Fully unrolled recurrence over the static, tiny sequence length.
    h = h0_ref[...]                                              # (1, H2P)
    c = c0_ref[...]                                              # (1, H2P)
    hs = []
    for t in range(T):
        gates = gates_x[t:t + 1, :] + jnp.dot(h, w_hh,
                                              preferred_element_type=f32)
        i_g = sigmoid(gates[:, 0 * H2P:1 * H2P])     # each slice = 1 full vreg
        f_g = sigmoid(gates[:, 1 * H2P:2 * H2P])
        g_g = jnp.tanh(gates[:, 2 * H2P:3 * H2P])
        o_g = sigmoid(gates[:, 3 * H2P:4 * H2P])
        c = f_g * c + i_g * g_g
        h = o_g * jnp.tanh(c)
        hs.append(h)

    hT_ref[...] = h
    cT_ref[...] = c

    # FC3 + tanh, scaled by 0.5, on all timesteps at once.
    lstm_out = jnp.concatenate(hs, axis=0)                       # (T, H2P)
    out_ref[...] = jnp.tanh(
        jnp.dot(lstm_out, w3_ref[...], preferred_element_type=f32)
        + b3_ref[...]) * 0.5


def _pad_gate_cols(w, H2, H2P):
    """Pad each of the 4 gate blocks along the last axis from H2 to H2P lanes."""
    if H2P == H2:
        return w
    lead = w.shape[:-1]
    w = w.reshape(lead + (4, H2))
    w = jnp.pad(w, [(0, 0)] * len(lead) + [(0, 0), (0, H2P - H2)])
    return w.reshape(lead + (4 * H2P,))


def actor_forward(obs, laser, h0, c0, params):
    T, dim_obs = obs.shape
    laser_cnt = laser.shape[1]
    d_pre = params["w_pre"].shape[1]            # 10
    H1 = params["w1"].shape[1]                  # hidden_layer
    H2 = params["w_hh"].shape[0]                # second_hidden_layer
    dim_action = params["w3"].shape[1]

    # Pad hidden width so every per-gate slice is a full 128-lane vreg.
    H2P = max(128, -(-H2 // 128) * 128)
    pad_h = H2P - H2

    # --- host-side weight prep (layout only, no semantic change) -------------
    w1_pre = params["w1"][:d_pre, :]            # (10, H1)
    w1_obs = params["w1"][d_pre:, :]            # (dim_obs, H1)

    w_ih = _pad_gate_cols(params["w_ih"], H2, H2P)                 # (H1, 4*H2P)
    w_hh = _pad_gate_cols(params["w_hh"], H2, H2P)                 # (H2, 4*H2P)
    w_hh = jnp.pad(w_hh, ((0, pad_h), (0, 0)))                     # (H2P, 4*H2P)
    b_lstm = _pad_gate_cols(params["b_lstm"], H2, H2P)             # (1, 4*H2P)
    w3 = jnp.pad(params["w3"], ((0, pad_h), (0, 0)))               # (H2P, dA)
    h0p = jnp.pad(h0, ((0, 0), (0, pad_h)))                        # (1, H2P)
    c0p = jnp.pad(c0, ((0, 0), (0, pad_h)))                        # (1, H2P)

    kernel = functools.partial(actor_kernel, T=T, H2P=H2P)
    vmem_spec = lambda: pl.BlockSpec(memory_space=pltpu.MemorySpace.VMEM)

    out_shape = (jax.ShapeDtypeStruct((T, dim_action), jnp.float32),  # actions
                 jax.ShapeDtypeStruct((1, H2P), jnp.float32),         # h_T (pad)
                 jax.ShapeDtypeStruct((1, H2P), jnp.float32))         # c_T (pad)

    inputs = (obs, laser, h0p, c0p,
              params["w_pre"], params["b_pre"],
              w1_pre, w1_obs, params["b1"],
              w_ih, w_hh, b_lstm,
              w3, params["b3"])

    flops = 2 * T * (laser_cnt * d_pre
                     + (d_pre + dim_obs) * H1
                     + H1 * 4 * H2P
                     + H2P * 4 * H2P
                     + H2P * dim_action)
    transcendentals = 5 * T * H2P + T * dim_action
    bytes_accessed = (sum(int(a.size) for a in inputs)
                      + T * dim_action + 2 * H2P) * 4

    out, hT, cT = pl.pallas_call(
        kernel,
        out_shape=out_shape,
        in_specs=[vmem_spec() for _ in range(len(inputs))],
        out_specs=(vmem_spec(), vmem_spec(), vmem_spec()),
        cost_estimate=pl.CostEstimate(flops=flops,
                                      transcendentals=transcendentals,
                                      bytes_accessed=bytes_accessed),
    )(*inputs)

    # Strip the (provably zero) hidden-state padding.
    return out, hT[:, :H2], cT[:, :H2]


def actor_ref(obs, laser, h0, c0, p):
    """Pure-JAX reference mirroring the PyTorch forward."""
    pre = jax.nn.relu(laser @ p["w_pre"] + p["b_pre"])
    combined = jnp.concatenate([pre, obs], axis=1)
    x1 = jax.nn.relu(combined @ p["w1"] + p["b1"])
    H2 = p["w_hh"].shape[0]

    def step(carry, x_t):
        h, c = carry                                  # (1, H2)
        gates = x_t @ p["w_ih"] + (h @ p["w_hh"])[0] + p["b_lstm"][0]
        i = jax.nn.sigmoid(gates[:H2])
        f = jax.nn.sigmoid(gates[H2:2 * H2])
        g = jnp.tanh(gates[2 * H2:3 * H2])
        o = jax.nn.sigmoid(gates[3 * H2:])
        c_new = f * c[0] + i * g
        h_new = o * jnp.tanh(c_new)
        return (h_new[None], c_new[None]), h_new

    (hT, cT), ys = lax.scan(step, (h0, c0), x1)
    out = jnp.tanh(ys @ p["w3"] + p["b3"][0]) * 0.5
    return out, hT, cT


def _uinit(key, shape, fan_in):
    bound = 1.0 / math.sqrt(fan_in)
    return jax.random.uniform(key, shape, jnp.float32, -bound, bound)


if __name__ == "__main__":
    # Small shapes consistent with the module's constructor.
    T = 8                     # sequence axis fed to the unbatched LSTM
    dim_observation = 22
    laser_cnt = 16
    dim_action = 4
    hidden_layer = 128        # H1
    second_hidden_layer = 64  # H2

    root = jax.random.PRNGKey(0)
    keys = jax.random.split(root, 16)

    params = {
        # PreFC: Linear(laser_cnt, 10)  -> stored as (in, out)
        "w_pre": _uinit(keys[0], (laser_cnt, 10), laser_cnt),
        "b_pre": _uinit(keys[1], (1, 10), laser_cnt),
        # FC1: Linear(dim_obs + 10, hidden_layer)
        "w1": _uinit(keys[2], (10 + dim_observation, hidden_layer),
                     10 + dim_observation),
        "b1": _uinit(keys[3], (1, hidden_layer), 10 + dim_observation),
        # LSTM(hidden_layer, second_hidden_layer); gate order (i, f, g, o)
        "w_ih": _uinit(keys[4], (hidden_layer, 4 * second_hidden_layer),
                       second_hidden_layer),
        "w_hh": _uinit(keys[5], (second_hidden_layer, 4 * second_hidden_layer),
                       second_hidden_layer),
        # b_ih + b_hh folded into one bias
        "b_lstm": (_uinit(keys[6], (1, 4 * second_hidden_layer),
                          second_hidden_layer)
                   + _uinit(keys[7], (1, 4 * second_hidden_layer),
                            second_hidden_layer)),
        # FC3: Linear(second_hidden_layer, dim_action)
        "w3": _uinit(keys[8], (second_hidden_layer, dim_action),
                     second_hidden_layer),
        "b3": _uinit(keys[9], (1, dim_action), second_hidden_layer),
    }

    obs = jax.random.normal(keys[10], (T, dim_observation), jnp.float32)
    laser = jax.random.normal(keys[11], (T, laser_cnt), jnp.float32)
    h0 = jax.random.normal(keys[12], (1, second_hidden_layer), jnp.float32) * 0.1
    c0 = jax.random.normal(keys[13], (1, second_hidden_layer), jnp.float32) * 0.1

    out, hT, cT = actor_forward(obs, laser, h0, c0, params)
    jax.block_until_ready((out, hT, cT))

    ref_out, ref_hT, ref_cT = actor_ref(obs, laser, h0, c0, params)
    assert jnp.allclose(out, ref_out, rtol=1e-3, atol=1e-3)
    assert jnp.allclose(hT, ref_hT, rtol=1e-3, atol=1e-3)
    assert jnp.allclose(cT, ref_cT, rtol=1e-3, atol=1e-3)

    print("KERNEL_OK")
</pallas_src>

<mosaic_0001>
module attributes {stable_mosaic.version = 11 : i64} {
  func.func @actor_kernel(%arg0: memref<8x22xf32, #tpu.memory_space<vmem>>, %arg1: memref<8x16xf32, #tpu.memory_space<vmem>>, %arg2: memref<1x128xf32, #tpu.memory_space<vmem>>, %arg3: memref<1x128xf32, #tpu.memory_space<vmem>>, %arg4: memref<16x10xf32, #tpu.memory_space<vmem>>, %arg5: memref<1x10xf32, #tpu.memory_space<vmem>>, %arg6: memref<10x128xf32, #tpu.memory_space<vmem>>, %arg7: memref<22x128xf32, #tpu.memory_space<vmem>>, %arg8: memref<1x128xf32, #tpu.memory_space<vmem>>, %arg9: memref<128x512xf32, #tpu.memory_space<vmem>>, %arg10: memref<128x512xf32, #tpu.memory_space<vmem>>, %arg11: memref<1x512xf32, #tpu.memory_space<vmem>>, %arg12: memref<128x4xf32, #tpu.memory_space<vmem>>, %arg13: memref<1x4xf32, #tpu.memory_space<vmem>>, %arg14: memref<8x4xf32, #tpu.memory_space<vmem>>, %arg15: memref<1x128xf32, #tpu.memory_space<vmem>>, %arg16: memref<1x128xf32, #tpu.memory_space<vmem>>) attributes {dimension_semantics = [], scalar_prefetch = 0 : i64, scratch_operands = 0 : i64, tpu.core_type = #tpu.core_type<tc>} {
    %c0 = arith.constant 0 : index
    %c0_0 = arith.constant 0 : index
    %0 = vector.load %arg1[%c0, %c0_0] : memref<8x16xf32, #tpu.memory_space<vmem>>, vector<8x16xf32>
    %c0_1 = arith.constant 0 : index
    %c0_2 = arith.constant 0 : index
    %1 = vector.load %arg4[%c0_1, %c0_2] : memref<16x10xf32, #tpu.memory_space<vmem>>, vector<16x10xf32>
    %cst = arith.constant dense<0.000000e+00> : vector<8x10xf32>
    %2 = tpu.matmul %0, %1, %cst {dimension_numbers = #tpu.dot_dimension_numbers<[1], [0], [0], [1], [0, 0, 1, 1], [], []>} : vector<8x16xf32>, vector<16x10xf32>, vector<8x10xf32> -> vector<8x10xf32>
    %c0_3 = arith.constant 0 : index
    %c0_4 = arith.constant 0 : index
    %3 = vector.load %arg5[%c0_3, %c0_4] : memref<1x10xf32, #tpu.memory_space<vmem>>, vector<1x10xf32>
    %4 = vector.broadcast %3 : vector<1x10xf32> to vector<8x10xf32>
    %5 = arith.addf %2, %4 : vector<8x10xf32>
    %cst_5 = arith.constant 0.000000e+00 : f32
    %6 = vector.broadcast %cst_5 : f32 to vector<8x10xf32>
    %7 = arith.maximumf %5, %6 : vector<8x10xf32>
    %c0_6 = arith.constant 0 : index
    %c0_7 = arith.constant 0 : index
    %8 = vector.load %arg6[%c0_6, %c0_7] : memref<10x128xf32, #tpu.memory_space<vmem>>, vector<10x128xf32>
    %cst_8 = arith.constant dense<0.000000e+00> : vector<8x128xf32>
    %9 = tpu.matmul %7, %8, %cst_8 {dimension_numbers = #tpu.dot_dimension_numbers<[1], [0], [0], [1], [0, 0, 1, 1], [], []>} : vector<8x10xf32>, vector<10x128xf32>, vector<8x128xf32> -> vector<8x128xf32>
    %c0_9 = arith.constant 0 : index
    %c0_10 = arith.constant 0 : index
    %10 = vector.load %arg0[%c0_9, %c0_10] : memref<8x22xf32, #tpu.memory_space<vmem>>, vector<8x22xf32>
    %c0_11 = arith.constant 0 : index
    %c0_12 = arith.constant 0 : index
    %11 = vector.load %arg7[%c0_11, %c0_12] : memref<22x128xf32, #tpu.memory_space<vmem>>, vector<22x128xf32>
    %cst_13 = arith.constant dense<0.000000e+00> : vector<8x128xf32>
    %12 = tpu.matmul %10, %11, %cst_13 {dimension_numbers = #tpu.dot_dimension_numbers<[1], [0], [0], [1], [0, 0, 1, 1], [], []>} : vector<8x22xf32>, vector<22x128xf32>, vector<8x128xf32> -> vector<8x128xf32>
    %13 = arith.addf %9, %12 : vector<8x128xf32>
    %c0_14 = arith.constant 0 : index
    %c0_15 = arith.constant 0 : index
    %14 = vector.load %arg8[%c0_14, %c0_15] : memref<1x128xf32, #tpu.memory_space<vmem>>, vector<1x128xf32>
    %15 = vector.broadcast %14 : vector<1x128xf32> to vector<8x128xf32>
    %16 = arith.addf %13, %15 : vector<8x128xf32>
    %cst_16 = arith.constant 0.000000e+00 : f32
    %17 = vector.broadcast %cst_16 : f32 to vector<8x128xf32>
    %18 = arith.maximumf %16, %17 : vector<8x128xf32>
    %c0_17 = arith.constant 0 : index
    %c0_18 = arith.constant 0 : index
    %19 = vector.load %arg9[%c0_17, %c0_18] : memref<128x512xf32, #tpu.memory_space<vmem>>, vector<128x512xf32>
    %cst_19 = arith.constant dense<0.000000e+00> : vector<8x512xf32>
    %20 = tpu.matmul %18, %19, %cst_19 {dimension_numbers = #tpu.dot_dimension_numbers<[1], [0], [0], [1], [0, 0, 1, 1], [], []>} : vector<8x128xf32>, vector<128x512xf32>, vector<8x512xf32> -> vector<8x512xf32>
    %c0_20 = arith.constant 0 : index
    %c0_21 = arith.constant 0 : index
    %21 = vector.load %arg11[%c0_20, %c0_21] : memref<1x512xf32, #tpu.memory_space<vmem>>, vector<1x512xf32>
    %22 = vector.broadcast %21 : vector<1x512xf32> to vector<8x512xf32>
    %23 = arith.addf %20, %22 : vector<8x512xf32>
    %c0_22 = arith.constant 0 : index
    %c0_23 = arith.constant 0 : index
    %24 = vector.load %arg10[%c0_22, %c0_23] : memref<128x512xf32, #tpu.memory_space<vmem>>, vector<128x512xf32>
    %c0_24 = arith.constant 0 : index
    %c0_25 = arith.constant 0 : index
    %25 = vector.load %arg2[%c0_24, %c0_25] : memref<1x128xf32, #tpu.memory_space<vmem>>, vector<1x128xf32>
    %c0_26 = arith.constant 0 : index
    %c0_27 = arith.constant 0 : index
    %26 = vector.load %arg3[%c0_26, %c0_27] : memref<1x128xf32, #tpu.memory_space<vmem>>, vector<1x128xf32>
    %27 = vector.extract_strided_slice %23 {offsets = [0, 0], sizes = [1, 512], strides = [1, 1]} : vector<8x512xf32> to vector<1x512xf32>
    %cst_28 = arith.constant dense<0.000000e+00> : vector<1x512xf32>
    %28 = tpu.matmul %25, %24, %cst_28 {dimension_numbers = #tpu.dot_dimension_numbers<[1], [0], [0], [1], [0, 0, 1, 1], [], []>} : vector<1x128xf32>, vector<128x512xf32>, vector<1x512xf32> -> vector<1x512xf32>
    %29 = arith.addf %27, %28 : vector<1x512xf32>
    %30 = vector.extract_strided_slice %29 {offsets = [0, 0], sizes = [1, 128], strides = [1, 1]} : vector<1x512xf32> to vector<1x128xf32>
    %cst_29 = arith.constant 5.000000e-01 : f32
    %31 = vector.broadcast %cst_29 : f32 to vector<1x128xf32>
    %32 = arith.mulf %31, %30 : vector<1x128xf32>
    %33 = math.tanh %32 : vector<1x128xf32>
    %cst_30 = arith.constant 5.000000e-01 : f32
    %34 = vector.broadcast %cst_30 : f32 to vector<1x128xf32>
    %35 = arith.mulf %34, %33 : vector<1x128xf32>
    %cst_31 = arith.constant 5.000000e-01 : f32
    %36 = vector.broadcast %cst_31 : f32 to vector<1x128xf32>
    %37 = arith.addf %35, %36 : vector<1x128xf32>
    %38 = vector.extract_strided_slice %29 {offsets = [0, 128], sizes = [1, 128], strides = [1, 1]} : vector<1x512xf32> to vector<1x128xf32>
    %cst_32 = arith.constant 5.000000e-01 : f32
    %39 = vector.broadcast %cst_32 : f32 to vector<1x128xf32>
    %40 = arith.mulf %39, %38 : vector<1x128xf32>
    %41 = math.tanh %40 : vector<1x128xf32>
    %cst_33 = arith.constant 5.000000e-01 : f32
    %42 = vector.broadcast %cst_33 : f32 to vector<1x128xf32>
    %43 = arith.mulf %42, %41 : vector<1x128xf32>
    %cst_34 = arith.constant 5.000000e-01 : f32
    %44 = vector.broadcast %cst_34 : f32 to vector<1x128xf32>
    %45 = arith.addf %43, %44 : vector<1x128xf32>
    %46 = vector.extract_strided_slice %29 {offsets = [0, 256], sizes = [1, 128], strides = [1, 1]} : vector<1x512xf32> to vector<1x128xf32>
    %47 = math.tanh %46 : vector<1x128xf32>
    %48 = vector.extract_strided_slice %29 {offsets = [0, 384], sizes = [1, 128], strides = [1, 1]} : vector<1x512xf32> to vector<1x128xf32>
    %cst_35 = arith.constant 5.000000e-01 : f32
    %49 = vector.broadcast %cst_35 : f32 to vector<1x128xf32>
    %50 = arith.mulf %49, %48 : vector<1x128xf32>
    %51 = math.tanh %50 : vector<1x128xf32>
    %cst_36 = arith.constant 5.000000e-01 : f32
    %52 = vector.broadcast %cst_36 : f32 to vector<1x128xf32>
    %53 = arith.mulf %52, %51 : vector<1x128xf32>
    %cst_37 = arith.constant 5.000000e-01 : f32
    %54 = vector.broadcast %cst_37 : f32 to vector<1x128xf32>
    %55 = arith.addf %53, %54 : vector<1x128xf32>
    %56 = arith.mulf %45, %26 : vector<1x128xf32>
    %57 = arith.mulf %37, %47 : vector<1x128xf32>
    %58 = arith.addf %56, %57 : vector<1x128xf32>
    %59 = math.tanh %58 : vector<1x128xf32>
    %60 = arith.mulf %55, %59 : vector<1x128xf32>
    %61 = vector.extract_strided_slice %23 {offsets = [1, 0], sizes = [1, 512], strides = [1, 1]} : vector<8x512xf32> to vector<1x512xf32>
    %cst_38 = arith.constant dense<0.000000e+00> : vector<1x512xf32>
    %62 = tpu.matmul %60, %24, %cst_38 {dimension_numbers = #tpu.dot_dimension_numbers<[1], [0], [0], [1], [0, 0, 1, 1], [], []>} : vector<1x128xf32>, vector<128x512xf32>, vector<1x512xf32> -> vector<1x512xf32>
    %63 = arith.addf %61, %62 : vector<1x512xf32>
    %64 = vector.extract_strided_slice %63 {offsets = [0, 0], sizes = [1, 128], strides = [1, 1]} : vector<1x512xf32> to vector<1x128xf32>
    %cst_39 = arith.constant 5.000000e-01 : f32
    %65 = vector.broadcast %cst_39 : f32 to vector<1x128xf32>
    %66 = arith.mulf %65, %64 : vector<1x128xf32>
    %67 = math.tanh %66 : vector<1x128xf32>
    %cst_40 = arith.constant 5.000000e-01 : f32
    %68 = vector.broadcast %cst_40 : f32 to vector<1x128xf32>
    %69 = arith.mulf %68, %67 : vector<1x128xf32>
    %cst_41 = arith.constant 5.000000e-01 : f32
    %70 = vector.broadcast %cst_41 : f32 to vector<1x128xf32>
    %71 = arith.addf %69, %70 : vector<1x128xf32>
    %72 = vector.extract_strided_slice %63 {offsets = [0, 128], sizes = [1, 128], strides = [1, 1]} : vector<1x512xf32> to vector<1x128xf32>
    %cst_42 = arith.constant 5.000000e-01 : f32
    %73 = vector.broadcast %cst_42 : f32 to vector<1x128xf32>
    %74 = arith.mulf %73, %72 : vector<1x128xf32>
    %75 = math.tanh %74 : vector<1x128xf32>
    %cst_43 = arith.constant 5.000000e-01 : f32
    %76 = vector.broadcast %cst_43 : f32 to vector<1x128xf32>
    %77 = arith.mulf %76, %75 : vector<1x128xf32>
    %cst_44 = arith.constant 5.000000e-01 : f32
    %78 = vector.broadcast %cst_44 : f32 to vector<1x128xf32>
    %79 = arith.addf %77, %78 : vector<1x128xf32>
    %80 = vector.extract_strided_slice %63 {offsets = [0, 256], sizes = [1, 128], strides = [1, 1]} : vector<1x512xf32> to vector<1x128xf32>
    %81 = math.tanh %80 : vector<1x128xf32>
    %82 = vector.extract_strided_slice %63 {offsets = [0, 384], sizes = [1, 128], strides = [1, 1]} : vector<1x512xf32> to vector<1x128xf32>
    %cst_45 = arith.constant 5.000000e-01 : f32
    %83 = vector.broadcast %cst_45 : f32 to vector<1x128xf32>
    %84 = arith.mulf %83, %82 : vector<1x128xf32>
    %85 = math.tanh %84 : vector<1x128xf32>
    %cst_46 = arith.constant 5.000000e-01 : f32
    %86 = vector.broadcast %cst_46 : f32 to vector<1x128xf32>
    %87 = arith.mulf %86, %85 : vector<1x128xf32>
    %cst_47 = arith.constant 5.000000e-01 : f32
    %88 = vector.broadcast %cst_47 : f32 to vector<1x128xf32>
    %89 = arith.addf %87, %88 : vector<1x128xf32>
    %90 = arith.mulf %79, %58 : vector<1x128xf32>
    %91 = arith.mulf %71, %81 : vector<1x128xf32>
    %92 = arith.addf %90, %91 : vector<1x128xf32>
    %93 = math.tanh %92 : vector<1x128xf32>
    %94 = arith.mulf %89, %93 : vector<1x128xf32>
    %95 = vector.extract_strided_slice %23 {offsets = [2, 0], sizes = [1, 512], strides = [1, 1]} : vector<8x512xf32> to vector<1x512xf32>
    %cst_48 = arith.constant dense<0.000000e+00> : vector<1x512xf32>
    %96 = tpu.matmul %94, %24, %cst_48 {dimension_numbers = #tpu.dot_dimension_numbers<[1], [0], [0], [1], [0, 0, 1, 1], [], []>} : vector<1x128xf32>, vector<128x512xf32>, vector<1x512xf32> -> vector<1x512xf32>
    %97 = arith.addf %95, %96 : vector<1x512xf32>
    %98 = vector.extract_strided_slice %97 {offsets = [0, 0], sizes = [1, 128], strides = [1, 1]} : vector<1x512xf32> to vector<1x128xf32>
    %cst_49 = arith.constant 5.000000e-01 : f32
    %99 = vector.broadcast %cst_49 : f32 to vector<1x128xf32>
    %100 = arith.mulf %99, %98 : vector<1x128xf32>
    %101 = math.tanh %100 : vector<1x128xf32>
    %cst_50 = arith.constant 5.000000e-01 : f32
    %102 = vector.broadcast %cst_50 : f32 to vector<1x128xf32>
    %103 = arith.mulf %102, %101 : vector<1x128xf32>
    %cst_51 = arith.constant 5.000000e-01 : f32
    %104 = vector.broadcast %cst_51 : f32 to vector<1x128xf32>
    %105 = arith.addf %103, %104 : vector<1x128xf32>
    %106 = vector.extract_strided_slice %97 {offsets = [0, 128], sizes = [1, 128], strides = [1, 1]} : vector<1x512xf32> to vector<1x128xf32>
    %cst_52 = arith.constant 5.000000e-01 : f32
    %107 = vector.broadcast %cst_52 : f32 to vector<1x128xf32>
    %108 = arith.mulf %107, %106 : vector<1x128xf32>
    %109 = math.tanh %108 : vector<1x128xf32>
    %cst_53 = arith.constant 5.000000e-01 : f32
    %110 = vector.broadcast %cst_53 : f32 to vector<1x128xf32>
    %111 = arith.mulf %110, %109 : vector<1x128xf32>
    %cst_54 = arith.constant 5.000000e-01 : f32
    %112 = vector.broadcast %cst_54 : f32 to vector<1x128xf32>
    %113 = arith.addf %111, %112 : vector<1x128xf32>
    %114 = vector.extract_strided_slice %97 {offsets = [0, 256], sizes = [1, 128], strides = [1, 1]} : vector<1x512xf32> to vector<1x128xf32>
    %115 = math.tanh %114 : vector<1x128xf32>
    %116 = vector.extract_strided_slice %97 {offsets = [0, 384], sizes = [1, 128], strides = [1, 1]} : vector<1x512xf32> to vector<1x128xf32>
    %cst_55 = arith.constant 5.000000e-01 : f32
    %117 = vector.broadcast %cst_55 : f32 to vector<1x128xf32>
    %118 = arith.mulf %117, %116 : vector<1x128xf32>
    %119 = math.tanh %118 : vector<1x128xf32>
    %cst_56 = arith.constant 5.000000e-01 : f32
    %120 = vector.broadcast %cst_56 : f32 to vector<1x128xf32>
    %121 = arith.mulf %120, %119 : vector<1x128xf32>
    %cst_57 = arith.constant 5.000000e-01 : f32
    %122 = vector.broadcast %cst_57 : f32 to vector<1x128xf32>
    %123 = arith.addf %121, %122 : vector<1x128xf32>
    %124 = arith.mulf %113, %92 : vector<1x128xf32>
    %125 = arith.mulf %105, %115 : vector<1x128xf32>
    %126 = arith.addf %124, %125 : vector<1x128xf32>
    %127 = math.tanh %126 : vector<1x128xf32>
    %128 = arith.mulf %123, %127 : vector<1x128xf32>
    %129 = vector.extract_strided_slice %23 {offsets = [3, 0], sizes = [1, 512], strides = [1, 1]} : vector<8x512xf32> to vector<1x512xf32>
    %cst_58 = arith.constant dense<0.000000e+00> : vector<1x512xf32>
    %130 = tpu.matmul %128, %24, %cst_58 {dimension_numbers = #tpu.dot_dimension_numbers<[1], [0], [0], [1], [0, 0, 1, 1], [], []>} : vector<1x128xf32>, vector<128x512xf32>, vector<1x512xf32> -> vector<1x512xf32>
    %131 = arith.addf %129, %130 : vector<1x512xf32>
    %132 = vector.extract_strided_slice %131 {offsets = [0, 0], sizes = [1, 128], strides = [1, 1]} : vector<1x512xf32> to vector<1x128xf32>
    %cst_59 = arith.constant 5.000000e-01 : f32
    %133 = vector.broadcast %cst_59 : f32 to vector<1x128xf32>
    %134 = arith.mulf %133, %132 : vector<1x128xf32>
    %135 = math.tanh %134 : vector<1x128xf32>
    %cst_60 = arith.constant 5.000000e-01 : f32
    %136 = vector.broadcast %cst_60 : f32 to vector<1x128xf32>
    %137 = arith.mulf %136, %135 : vector<1x128xf32>
    %cst_61 = arith.constant 5.000000e-01 : f32
    %138 = vector.broadcast %cst_61 : f32 to vector<1x128xf32>
    %139 = arith.addf %137, %138 : vector<1x128xf32>
    %140 = vector.extract_strided_slice %131 {offsets = [0, 128], sizes = [1, 128], strides = [1, 1]} : vector<1x512xf32> to vector<1x128xf32>
    %cst_62 = arith.constant 5.000000e-01 : f32
    %141 = vector.broadcast %cst_62 : f32 to vector<1x128xf32>
    %142 = arith.mulf %141, %140 : vector<1x128xf32>
    %143 = math.tanh %142 : vector<1x128xf32>
    %cst_63 = arith.constant 5.000000e-01 : f32
    %144 = vector.broadcast %cst_63 : f32 to vector<1x128xf32>
    %145 = arith.mulf %144, %143 : vector<1x128xf32>
    %cst_64 = arith.constant 5.000000e-01 : f32
    %146 = vector.broadcast %cst_64 : f32 to vector<1x128xf32>
    %147 = arith.addf %145, %146 : vector<1x128xf32>
    %148 = vector.extract_strided_slice %131 {offsets = [0, 256], sizes = [1, 128], strides = [1, 1]} : vector<1x512xf32> to vector<1x128xf32>
    %149 = math.tanh %148 : vector<1x128xf32>
    %150 = vector.extract_strided_slice %131 {offsets = [0, 384], sizes = [1, 128], strides = [1, 1]} : vector<1x512xf32> to vector<1x128xf32>
    %cst_65 = arith.constant 5.000000e-01 : f32
    %151 = vector.broadcast %cst_65 : f32 to vector<1x128xf32>
    %152 = arith.mulf %151, %150 : vector<1x128xf32>
    %153 = math.tanh %152 : vector<1x128xf32>
    %cst_66 = arith.constant 5.000000e-01 : f32
    %154 = vector.broadcast %cst_66 : f32 to vector<1x128xf32>
    %155 = arith.mulf %154, %153 : vector<1x128xf32>
    %cst_67 = arith.constant 5.000000e-01 : f32
    %156 = vector.broadcast %cst_67 : f32 to vector<1x128xf32>
    %157 = arith.addf %155, %156 : vector<1x128xf32>
    %158 = arith.mulf %147, %126 : vector<1x128xf32>
    %159 = arith.mulf %139, %149 : vector<1x128xf32>
    %160 = arith.addf %158, %159 : vector<1x128xf32>
    %161 = math.tanh %160 : vector<1x128xf32>
    %162 = arith.mulf %157, %161 : vector<1x128xf32>
    %163 = vector.extract_strided_slice %23 {offsets = [4, 0], sizes = [1, 512], strides = [1, 1]} : vector<8x512xf32> to vector<1x512xf32>
    %cst_68 = arith.constant dense<0.000000e+00> : vector<1x512xf32>
    %164 = tpu.matmul %162, %24, %cst_68 {dimension_numbers = #tpu.dot_dimension_numbers<[1], [0], [0], [1], [0, 0, 1, 1], [], []>} : vector<1x128xf32>, vector<128x512xf32>, vector<1x512xf32> -> vector<1x512xf32>
    %165 = arith.addf %163, %164 : vector<1x512xf32>
    %166 = vector.extract_strided_slice %165 {offsets = [0, 0], sizes = [1, 128], strides = [1, 1]} : vector<1x512xf32> to vector<1x128xf32>
    %cst_69 = arith.constant 5.000000e-01 : f32
    %167 = vector.broadcast %cst_69 : f32 to vector<1x128xf32>
    %168 = arith.mulf %167, %166 : vector<1x128xf32>
    %169 = math.tanh %168 : vector<1x128xf32>
    %cst_70 = arith.constant 5.000000e-01 : f32
    %170 = vector.broadcast %cst_70 : f32 to vector<1x128xf32>
    %171 = arith.mulf %170, %169 : vector<1x128xf32>
    %cst_71 = arith.constant 5.000000e-01 : f32
    %172 = vector.broadcast %cst_71 : f32 to vector<1x128xf32>
    %173 = arith.addf %171, %172 : vector<1x128xf32>
    %174 = vector.extract_strided_slice %165 {offsets = [0, 128], sizes = [1, 128], strides = [1, 1]} : vector<1x512xf32> to vector<1x128xf32>
    %cst_72 = arith.constant 5.000000e-01 : f32
    %175 = vector.broadcast %cst_72 : f32 to vector<1x128xf32>
    %176 = arith.mulf %175, %174 : vector<1x128xf32>
    %177 = math.tanh %176 : vector<1x128xf32>
    %cst_73 = arith.constant 5.000000e-01 : f32
    %178 = vector.broadcast %cst_73 : f32 to vector<1x128xf32>
    %179 = arith.mulf %178, %177 : vector<1x128xf32>
    %cst_74 = arith.constant 5.000000e-01 : f32
    %180 = vector.broadcast %cst_74 : f32 to vector<1x128xf32>
    %181 = arith.addf %179, %180 : vector<1x128xf32>
    %182 = vector.extract_strided_slice %165 {offsets = [0, 256], sizes = [1, 128], strides = [1, 1]} : vector<1x512xf32> to vector<1x128xf32>
    %183 = math.tanh %182 : vector<1x128xf32>
    %184 = vector.extract_strided_slice %165 {offsets = [0, 384], sizes = [1, 128], strides = [1, 1]} : vector<1x512xf32> to vector<1x128xf32>
    %cst_75 = arith.constant 5.000000e-01 : f32
    %185 = vector.broadcast %cst_75 : f32 to vector<1x128xf32>
    %186 = arith.mulf %185, %184 : vector<1x128xf32>
    %187 = math.tanh %186 : vector<1x128xf32>
    %cst_76 = arith.constant 5.000000e-01 : f32
    %188 = vector.broadcast %cst_76 : f32 to vector<1x128xf32>
    %189 = arith.mulf %188, %187 : vector<1x128xf32>
    %cst_77 = arith.constant 5.000000e-01 : f32
    %190 = vector.broadcast %cst_77 : f32 to vector<1x128xf32>
    %191 = arith.addf %189, %190 : vector<1x128xf32>
    %192 = arith.mulf %181, %160 : vector<1x128xf32>
    %193 = arith.mulf %173, %183 : vector<1x128xf32>
    %194 = arith.addf %192, %193 : vector<1x128xf32>
    %195 = math.tanh %194 : vector<1x128xf32>
    %196 = arith.mulf %191, %195 : vector<1x128xf32>
    %197 = vector.extract_strided_slice %23 {offsets = [5, 0], sizes = [1, 512], strides = [1, 1]} : vector<8x512xf32> to vector<1x512xf32>
    %cst_78 = arith.constant dense<0.000000e+00> : vector<1x512xf32>
    %198 = tpu.matmul %196, %24, %cst_78 {dimension_numbers = #tpu.dot_dimension_numbers<[1], [0], [0], [1], [0, 0, 1, 1], [], []>} : vector<1x128xf32>, vector<128x512xf32>, vector<1x512xf32> -> vector<1x512xf32>
    %199 = arith.addf %197, %198 : vector<1x512xf32>
    %200 = vector.extract_strided_slice %199 {offsets = [0, 0], sizes = [1, 128], strides = [1, 1]} : vector<1x512xf32> to vector<1x128xf32>
    %cst_79 = arith.constant 5.000000e-01 : f32
    %201 = vector.broadcast %cst_79 : f32 to vector<1x128xf32>
    %202 = arith.mulf %201, %200 : vector<1x128xf32>
    %203 = math.tanh %202 : vector<1x128xf32>
    %cst_80 = arith.constant 5.000000e-01 : f32
    %204 = vector.broadcast %cst_80 : f32 to vector<1x128xf32>
    %205 = arith.mulf %204, %203 : vector<1x128xf32>
    %cst_81 = arith.constant 5.000000e-01 : f32
    %206 = vector.broadcast %cst_81 : f32 to vector<1x128xf32>
    %207 = arith.addf %205, %206 : vector<1x128xf32>
    %208 = vector.extract_strided_slice %199 {offsets = [0, 128], sizes = [1, 128], strides = [1, 1]} : vector<1x512xf32> to vector<1x128xf32>
    %cst_82 = arith.constant 5.000000e-01 : f32
    %209 = vector.broadcast %cst_82 : f32 to vector<1x128xf32>
    %210 = arith.mulf %209, %208 : vector<1x128xf32>
    %211 = math.tanh %210 : vector<1x128xf32>
    %cst_83 = arith.constant 5.000000e-01 : f32
    %212 = vector.broadcast %cst_83 : f32 to vector<1x128xf32>
    %213 = arith.mulf %212, %211 : vector<1x128xf32>
    %cst_84 = arith.constant 5.000000e-01 : f32
    %214 = vector.broadcast %cst_84 : f32 to vector<1x128xf32>
    %215 = arith.addf %213, %214 : vector<1x128xf32>
    %216 = vector.extract_strided_slice %199 {offsets = [0, 256], sizes = [1, 128], strides = [1, 1]} : vector<1x512xf32> to vector<1x128xf32>
    %217 = math.tanh %216 : vector<1x128xf32>
    %218 = vector.extract_strided_slice %199 {offsets = [0, 384], sizes = [1, 128], strides = [1, 1]} : vector<1x512xf32> to vector<1x128xf32>
    %cst_85 = arith.constant 5.000000e-01 : f32
    %219 = vector.broadcast %cst_85 : f32 to vector<1x128xf32>
    %220 = arith.mulf %219, %218 : vector<1x128xf32>
    %221 = math.tanh %220 : vector<1x128xf32>
    %cst_86 = arith.constant 5.000000e-01 : f32
    %222 = vector.broadcast %cst_86 : f32 to vector<1x128xf32>
    %223 = arith.mulf %222, %221 : vector<1x128xf32>
    %cst_87 = arith.constant 5.000000e-01 : f32
    %224 = vector.broadcast %cst_87 : f32 to vector<1x128xf32>
    %225 = arith.addf %223, %224 : vector<1x128xf32>
    %226 = arith.mulf %215, %194 : vector<1x128xf32>
    %227 = arith.mulf %207, %217 : vector<1x128xf32>
    %228 = arith.addf %226, %227 : vector<1x128xf32>
    %229 = math.tanh %228 : vector<1x128xf32>
    %230 = arith.mulf %225, %229 : vector<1x128xf32>
    %231 = vector.extract_strided_slice %23 {offsets = [6, 0], sizes = [1, 512], strides = [1, 1]} : vector<8x512xf32> to vector<1x512xf32>
    %cst_88 = arith.constant dense<0.000000e+00> : vector<1x512xf32>
    %232 = tpu.matmul %230, %24, %cst_88 {dimension_numbers = #tpu.dot_dimension_numbers<[1], [0], [0], [1], [0, 0, 1, 1], [], []>} : vector<1x128xf32>, vector<128x512xf32>, vector<1x512xf32> -> vector<1x512xf32>
    %233 = arith.addf %231, %232 : vector<1x512xf32>
    %234 = vector.extract_strided_slice %233 {offsets = [0, 0], sizes = [1, 128], strides = [1, 1]} : vector<1x512xf32> to vector<1x128xf32>
    %cst_89 = arith.constant 5.000000e-01 : f32
    %235 = vector.broadcast %cst_89 : f32 to vector<1x128xf32>
    %236 = arith.mulf %235, %234 : vector<1x128xf32>
    %237 = math.tanh %236 : vector<1x128xf32>
    %cst_90 = arith.constant 5.000000e-01 : f32
    %238 = vector.broadcast %cst_90 : f32 to vector<1x128xf32>
    %239 = arith.mulf %238, %237 : vector<1x128xf32>
    %cst_91 = arith.constant 5.000000e-01 : f32
    %240 = vector.broadcast %cst_91 : f32 to vector<1x128xf32>
    %241 = arith.addf %239, %240 : vector<1x128xf32>
    %242 = vector.extract_strided_slice %233 {offsets = [0, 128], sizes = [1, 128], strides = [1, 1]} : vector<1x512xf32> to vector<1x128xf32>
    %cst_92 = arith.constant 5.000000e-01 : f32
    %243 = vector.broadcast %cst_92 : f32 to vector<1x128xf32>
    %244 = arith.mulf %243, %242 : vector<1x128xf32>
    %245 = math.tanh %244 : vector<1x128xf32>
    %cst_93 = arith.constant 5.000000e-01 : f32
    %246 = vector.broadcast %cst_93 : f32 to vector<1x128xf32>
    %247 = arith.mulf %246, %245 : vector<1x128xf32>
    %cst_94 = arith.constant 5.000000e-01 : f32
    %248 = vector.broadcast %cst_94 : f32 to vector<1x128xf32>
    %249 = arith.addf %247, %248 : vector<1x128xf32>
    %250 = vector.extract_strided_slice %233 {offsets = [0, 256], sizes = [1, 128], strides = [1, 1]} : vector<1x512xf32> to vector<1x128xf32>
    %251 = math.tanh %250 : vector<1x128xf32>
    %252 = vector.extract_strided_slice %233 {offsets = [0, 384], sizes = [1, 128], strides = [1, 1]} : vector<1x512xf32> to vector<1x128xf32>
    %cst_95 = arith.constant 5.000000e-01 : f32
    %253 = vector.broadcast %cst_95 : f32 to vector<1x128xf32>
    %254 = arith.mulf %253, %252 : vector<1x128xf32>
    %255 = math.tanh %254 : vector<1x128xf32>
    %cst_96 = arith.constant 5.000000e-01 : f32
    %256 = vector.broadcast %cst_96 : f32 to vector<1x128xf32>
    %257 = arith.mulf %256, %255 : vector<1x128xf32>
    %cst_97 = arith.constant 5.000000e-01 : f32
    %258 = vector.broadcast %cst_97 : f32 to vector<1x128xf32>
    %259 = arith.addf %257, %258 : vector<1x128xf32>
    %260 = arith.mulf %249, %228 : vector<1x128xf32>
    %261 = arith.mulf %241, %251 : vector<1x128xf32>
    %262 = arith.addf %260, %261 : vector<1x128xf32>
    %263 = math.tanh %262 : vector<1x128xf32>
    %264 = arith.mulf %259, %263 : vector<1x128xf32>
    %265 = vector.extract_strided_slice %23 {offsets = [7, 0], sizes = [1, 512], strides = [1, 1]} : vector<8x512xf32> to vector<1x512xf32>
    %cst_98 = arith.constant dense<0.000000e+00> : vector<1x512xf32>
    %266 = tpu.matmul %264, %24, %cst_98 {dimension_numbers = #tpu.dot_dimension_numbers<[1], [0], [0], [1], [0, 0, 1, 1], [], []>} : vector<1x128xf32>, vector<128x512xf32>, vector<1x512xf32> -> vector<1x512xf32>
    %267 = arith.addf %265, %266 : vector<1x512xf32>
    %268 = vector.extract_strided_slice %267 {offsets = [0, 0], sizes = [1, 128], strides = [1, 1]} : vector<1x512xf32> to vector<1x128xf32>
    %cst_99 = arith.constant 5.000000e-01 : f32
    %269 = vector.broadcast %cst_99 : f32 to vector<1x128xf32>
    %270 = arith.mulf %269, %268 : vector<1x128xf32>
    %271 = math.tanh %270 : vector<1x128xf32>
    %cst_100 = arith.constant 5.000000e-01 : f32
    %272 = vector.broadcast %cst_100 : f32 to vector<1x128xf32>
    %273 = arith.mulf %272, %271 : vector<1x128xf32>
    %cst_101 = arith.constant 5.000000e-01 : f32
    %274 = vector.broadcast %cst_101 : f32 to vector<1x128xf32>
    %275 = arith.addf %273, %274 : vector<1x128xf32>
    %276 = vector.extract_strided_slice %267 {offsets = [0, 128], sizes = [1, 128], strides = [1, 1]} : vector<1x512xf32> to vector<1x128xf32>
    %cst_102 = arith.constant 5.000000e-01 : f32
    %277 = vector.broadcast %cst_102 : f32 to vector<1x128xf32>
    %278 = arith.mulf %277, %276 : vector<1x128xf32>
    %279 = math.tanh %278 : vector<1x128xf32>
    %cst_103 = arith.constant 5.000000e-01 : f32
    %280 = vector.broadcast %cst_103 : f32 to vector<1x128xf32>
    %281 = arith.mulf %280, %279 : vector<1x128xf32>
    %cst_104 = arith.constant 5.000000e-01 : f32
    %282 = vector.broadcast %cst_104 : f32 to vector<1x128xf32>
    %283 = arith.addf %281, %282 : vector<1x128xf32>
    %284 = vector.extract_strided_slice %267 {offsets = [0, 256], sizes = [1, 128], strides = [1, 1]} : vector<1x512xf32> to vector<1x128xf32>
    %285 = math.tanh %284 : vector<1x128xf32>
    %286 = vector.extract_strided_slice %267 {offsets = [0, 384], sizes = [1, 128], strides = [1, 1]} : vector<1x512xf32> to vector<1x128xf32>
    %cst_105 = arith.constant 5.000000e-01 : f32
    %287 = vector.broadcast %cst_105 : f32 to vector<1x128xf32>
    %288 = arith.mulf %287, %286 : vector<1x128xf32>
    %289 = math.tanh %288 : vector<1x128xf32>
    %cst_106 = arith.constant 5.000000e-01 : f32
    %290 = vector.broadcast %cst_106 : f32 to vector<1x128xf32>
    %291 = arith.mulf %290, %289 : vector<1x128xf32>
    %cst_107 = arith.constant 5.000000e-01 : f32
    %292 = vector.broadcast %cst_107 : f32 to vector<1x128xf32>
    %293 = arith.addf %291, %292 : vector<1x128xf32>
    %294 = arith.mulf %283, %262 : vector<1x128xf32>
    %295 = arith.mulf %275, %285 : vector<1x128xf32>
    %296 = arith.addf %294, %295 : vector<1x128xf32>
    %297 = math.tanh %296 : vector<1x128xf32>
    %298 = arith.mulf %293, %297 : vector<1x128xf32>
    %c0_108 = arith.constant 0 : index
    %c0_109 = arith.constant 0 : index
    %299 = vector.load %arg15[%c0_108, %c0_109] : memref<1x128xf32, #tpu.memory_space<vmem>>, vector<1x128xf32>
    tpu.vector_store %arg15[%c0_108, %c0_109], %298 {strides = array<i32>} : memref<1x128xf32, #tpu.memory_space<vmem>>, vector<1x128xf32>,
    %c0_110 = arith.constant 0 : index
    %c0_111 = arith.constant 0 : index
    %300 = vector.load %arg16[%c0_110, %c0_111] : memref<1x128xf32, #tpu.memory_space<vmem>>, vector<1x128xf32>
    tpu.vector_store %arg16[%c0_110, %c0_111], %296 {strides = array<i32>} : memref<1x128xf32, #tpu.memory_space<vmem>>, vector<1x128xf32>,
    %301 = tpu.concatenate %60, %94, %128, %162, %196, %230, %264, %298 in 0 : vector<1x128xf32>, vector<1x128xf32>, vector<1x128xf32>, vector<1x128xf32>, vector<1x128xf32>, vector<1x128xf32>, vector<1x128xf32>, vector<1x128xf32> -> vector<8x128xf32>
    %c0_112 = arith.constant 0 : index
    %c0_113 = arith.constant 0 : index
    %302 = vector.load %arg12[%c0_112, %c0_113] : memref<128x4xf32, #tpu.memory_space<vmem>>, vector<128x4xf32>
    %cst_114 = arith.constant dense<0.000000e+00> : vector<8x4xf32>
    %303 = tpu.matmul %301, %302, %cst_114 {dimension_numbers = #tpu.dot_dimension_numbers<[1], [0], [0], [1], [0, 0, 1, 1], [], []>} : vector<8x128xf32>, vector<128x4xf32>, vector<8x4xf32> -> vector<8x4xf32>
    %c0_115 = arith.constant 0 : index
    %c0_116 = arith.constant 0 : index
    %304 = vector.load %arg13[%c0_115, %c0_116] : memref<1x4xf32, #tpu.memory_space<vmem>>, vector<1x4xf32>
    %305 = vector.broadcast %304 : vector<1x4xf32> to vector<8x4xf32>
    %306 = arith.addf %303, %305 : vector<8x4xf32>
    %307 = math.tanh %306 : vector<8x4xf32>
    %cst_117 = arith.constant 5.000000e-01 : f32
    %308 = vector.broadcast %cst_117 : f32 to vector<8x4xf32>
    %309 = arith.mulf %307, %308 : vector<8x4xf32>
    %c0_118 = arith.constant 0 : index
    %c0_119 = arith.constant 0 : index
    %310 = vector.load %arg14[%c0_118, %c0_119] : memref<8x4xf32, #tpu.memory_space<vmem>>, vector<8x4xf32>
    tpu.vector_store %arg14[%c0_118, %c0_119], %309 {strides = array<i32>} : memref<8x4xf32, #tpu.memory_space<vmem>>, vector<8x4xf32>,
    return
  }
}

</mosaic_0001>

<bundles_post_ra>
// kernel: tpu_custom_call.1
= control target key start
LH: loop header
LB: loop body
LE: loop exit
PB: predicated region body
PF: predicated region fallthrough
CT: control target
= control target key end

     0   :  { %s3662_s0 = inlined_call_operand.vmem [shape: f32[8,22], index: 0, kind: input, shape index: {}]   ;;  %s3663_s1 = inlined_call_operand.vmem [shape: f32[8,16], index: 1, kind: input, shape index: {}]   ;;  %s3664_s2 = inlined_call_operand.vmem [shape: f32[1,128], index: 2, kind: input, shape index: {}]   ;;  %s3665_s3 = inlined_call_operand.vmem [shape: f32[1,128], index: 3, kind: input, shape index: {}]   ;;  %s3666_s4 = inlined_call_operand.vmem [shape: f32[16,10], index: 4, kind: input, shape index: {}]   ;;  %s3667_s5 = inlined_call_operand.vmem [shape: f32[1,10], index: 5, kind: input, shape index: {}]   ;;  %s3668_s6 = inlined_call_operand.vmem [shape: f32[10,128], index: 6, kind: input, shape index: {}]   ;;  %s3669_s7 = inlined_call_operand.vmem [shape: f32[22,128], index: 7, kind: input, shape index: {}]   ;;  %s3670_s8 = inlined_call_operand.vmem [shape: f32[1,128], index: 8, kind: input, shape index: {}]   ;;  %s3671_s9 = inlined_call_operand.hbm [shape: f32[128,512], index: 9, kind: input, shape index: {}]   ;;  %s3672_s10 = inlined_call_operand.hbm [shape: f32[128,512], index: 10, kind: input, shape index: {}]   ;;  %s3673_s11 = inlined_call_operand.vmem [shape: f32[1,512], index: 11, kind: input, shape index: {}]   ;;  %s3674_s12 = inlined_call_operand.vmem [shape: f32[128,4], index: 12, kind: input, shape index: {}]   ;;  %s3675_s13 = inlined_call_operand.vmem [shape: f32[1,4], index: 13, kind: input, shape index: {}]   ;;  %s3676_s14 = inlined_call_operand.vmem [shape: f32[8,4], index: 14, kind: output, shape index: {0}]   ;;  %s3677_s15 = inlined_call_operand.hbm [shape: f32[1,128], index: 15, kind: output, shape index: {1}]   ;;  %s3678_s16 = inlined_call_operand.hbm [shape: f32[1,128], index: 16, kind: output, shape index: {2}]  }
   0x1   :  { %3779 = sst [smem:[#allocation39_spill]] %s3662_s0 }
   0x2   :  { %22 = vsyncpa [#allocation3], 0 }
   0x3   :  { %23 = vsyncpa [#allocation6], 0 }
   0x4   :  { %24 = vsyncpa [#allocation4], 0 }
   0x5   :  { %25 = vsyncpa [#allocation9], 0  ;;  %s2545_s21 = smov [#allocation2]  }
   0x6   :  { %s49_s22 = sshll.u32 %s2545_s21, 4  ;;  %s50_s22 = int_to_ptr.vmem [resolvable:$true] %s49_s22 }
   0x7   :  { %s2465_s23 = scalar_lea.vmem %s50_s22, 8192  ;;  %p2470_p1 = scmp.lt.s32.totalorder %s50_s22, %s50_s22 }
   0x8   :  { %p2466_p0 = scmp.ne.s32.totalorder %s50_s22, %s2465_s23  ;;  %p2471_p2 = scmp.lt.s32.totalorder %s2465_s23, %s2465_s23 }
   0xa   :  { %p2472_p3 = por %p2471_p2, %p2470_p1 }
   0xc   :  { %p2473_p4 = pnand %p2472_p3, %p2466_p0 }
   0xe   :  { %2476 = shalt.err (!%p2473_p4)
}
   0xf   :  { %s2546_s24 = smov 512   ;;  %s2547_s25 = smov 32  }
  0x10   :  { %55 = dma.hbm_to_vmem [thread:$0]  %s3671_s9, 8192, %s50_s22, [#allocation3], %s2546_s24, %s2546_s24, %s2547_s25  }
  0x11   :  { %s2548_s28 = smov [#allocation5]  }
  0x12   :  { %s61_s29 = sshll.u32 %s2548_s28, 4  ;;  %s62_s29 = int_to_ptr.vmem [resolvable:$true] %s61_s29 }
  0x13   :  { %s2485_s30 = scalar_lea.vmem %s62_s29, 8192  ;;  %p2490_p6 = scmp.lt.s32.totalorder %s62_s29, %s62_s29 }
  0x14   :  { %p2486_p5 = scmp.ne.s32.totalorder %s62_s29, %s2485_s30  ;;  %p2491_p7 = scmp.lt.s32.totalorder %s2485_s30, %s2485_s30 }
  0x16   :  { %p2492_p8 = por %p2491_p7, %p2490_p6 }
  0x18   :  { %p2493_p9 = pnand %p2492_p8, %p2486_p5 }
  0x1a   :  { %2496 = shalt.err (!%p2493_p9)
}
  0x1b   :  { %67 = dma.hbm_to_vmem [thread:$0]  %s3672_s10, 8192, %s62_s29, [#allocation6], %s2546_s24, %s2546_s24, %s2547_s25  }
  0x1c   :  { %2537 = dma.done.wait [#allocation3], 8192  }
  0x1d   :  { %2538 = vsyncadd [#allocation3], 4294959104 }
  0x1e   :  { %2539 = dma.done.wait [#allocation6], 8192  }
  0x1f   :  { %2540 = vsyncadd [#allocation6], 4294959104  ;;  %v3679_v0 = vmov 0.0   ;;  %vm2550_vm0 = vmmov 0   ;;  %v82_v1 = vld [vmem:[%s3666_s4 + $0x8] sm:$0xff]  ;;  %v81_v2 = vld [vmem:[%s3666_s4] sm:$0xff] }
  0x20   :  { %2245 = vmatprep.subr.mxu0 %v3679_v0  ;;  %2249 = vmatprep.mubr.msk.f32.mxu0 %vm2550_vm0, %v3679_v0  ;;  %v80_v3 = vld [vmem:[%s3663_s1] sm:$0xff]  ;;  %vm90_vm1 = vcmask 130048   ;;  %v170_v4 = vld [vmem:[%s3669_s7 + $0x10] sm:$0x3f]  ;;  %vm175_vm2 = vcmask 1045504   ;;  %v169_v5 = vld [vmem:[%s3669_s7 + $0x8] sm:$0xff] }
  0x21   :  { %486 = vmatprep.mubr.f32.mxu1 %v3679_v0  ;;  %2246 = vmatpush3.msra.mxu0 %v82_v1  ;;  %v168_v6 = vld [vmem:[%s3669_s7] sm:$0xff]  ;;  %s3780_s28 = sld [smem:[#allocation39_spill]]  ;;  %vm171_vm3 = vcmask 179200   ;;  %v166_v8 = vld [vmem:[%s3668_s6 + $0x8] sm:$0x3]  ;;  %vm253_vm4 = vcmask 1041408  }
  0x22   :  { %2247 = vmatprep.subr.mxu0 %v3679_v0  ;;  %v165_v9 = vld [vmem:[%s3668_s6] sm:$0xff]  ;;  %v397_v10 = vld [vmem:[#allocation2 + $0x1e8] sm:$0xff]  ;;  %v399_v11 = vld [vmem:[#allocation2 + $0x1f8] sm:$0xff]  ;;  %vm249_vm5 = vcmask 80896   ;;  %vm2067_vm6 = vcmask 1040384   ;;  %vm2070_vm7 = vcmask 1042432  }
  0x23   :  { %2248 = vmatpush3.msra.mxu0 %v81_v2  ;;  %v396_v12 = vld [vmem:[#allocation2 + $0x1e0] sm:$0xff]  ;;  %422 = vmatprep.subr.mxu1 %v397_v10  ;;  %v393_v13 = vld [vmem:[#allocation2 + $0x1c8] sm:$0xff]  ;;  %v398_v42 = vld [vmem:[#allocation2 + $0x1f0] sm:$0xff]  ;;  %vm2072_vm8 = vcmask 1043456   ;;  %vm2074_vm9 = vcmask 1044480   ;;  %vm2077_vm10 = vcmask 1046528  }
  0x24   :  { %2250 = vmatmul.mubr.msk.f32.vlgmr.msra.gmra.mxu0 %vm90_vm1, %v80_v3  ;;  %2252 = vmatprep.subr.mxu0 %v3679_v0  ;;  %v392_v14 = vld [vmem:[#allocation2 + $0x1c0] sm:$0xff]  ;;  %v389_v15 = vld [vmem:[#allocation2 + $0x1a8] sm:$0xff]  ;;  %v395_v43 = vld [vmem:[#allocation2 + $0x1d8] sm:$0xff]  ;;  %s2552_s1 = smov [#allocation8]  }
  0x25   :  { %2253 = vmatpush3.msk.msra.mxu0 %vm175_vm2, %v170_v4  ;;  %2258 = vmatprep.mubr.msk.f32.mxu0 %vm2550_vm0, %v3679_v0  ;;  %v388_v16 = vld [vmem:[#allocation2 + $0x1a0] sm:$0xff]  ;;  %v385_v17 = vld [vmem:[#allocation2 + $0x188] sm:$0xff]  ;;  %v394_v44 = vld [vmem:[#allocation2 + $0x1d0] sm:$0xff]  ;;  %s2194_s4 = sshll.u32 %s2552_s1, 4  ;;  %s2195_s4 = int_to_ptr.vmem [resolvable:$true] %s2194_s4 }
  0x26   :  { %2254 = vmatprep.subr.mxu0 %v3679_v0  ;;  %423 = vmatpush1.msra.mxu1 %v396_v12  ;;  %v384_v18 = vld [vmem:[#allocation2 + $0x180] sm:$0xff]  ;;  %v381_v19 = vld [vmem:[#allocation2 + $0x168] sm:$0xff]  ;;  %v391_v45 = vld [vmem:[#allocation2 + $0x1b8] sm:$0xff] }
  0x27   :  { %2255 = vmatpush3.msra.mxu0 %v169_v5  ;;  %v167_v7 = vld [vmem:[%s3780_s28] sm:$0xff]  ;;  %424 = vmatprep.subr.mxu1 %v393_v13  ;;  %v377_v21 = vld [vmem:[#allocation2 + $0x148] sm:$0xff]  ;;  %v390_v47 = vld [vmem:[#allocation2 + $0x1b0] sm:$0xff] }
  0x28   :  { %2256 = vmatprep.subr.mxu0 %v3679_v0  ;;  %425 = vmatpush1.msra.mxu1 %v392_v14  ;;  %v380_v20 = vld [vmem:[#allocation2 + $0x160] sm:$0xff]  ;;  %v373_v23 = vld [vmem:[#allocation2 + $0x128] sm:$0xff]  ;;  %v387_v48 = vld [vmem:[#allocation2 + $0x198] sm:$0xff] }
  0x29   :  { %2257 = vmatpush3.msra.mxu0 %v168_v6  ;;  %426 = vmatprep.subr.mxu1 %v389_v15  ;;  %v376_v22 = vld [vmem:[#allocation2 + $0x140] sm:$0xff]  ;;  %v369_v25 = vld [vmem:[#allocation2 + $0x108] sm:$0xff]  ;;  %v386_v50 = vld [vmem:[#allocation2 + $0x190] sm:$0xff] }
  0x2a   :  { %2259 = vmatmul.mubr.msk.f32.vlgmr.msra.gmra.mxu0 %vm171_vm3, %v167_v7  ;;  %2261 = vmatprep.subr.mxu0 %v3679_v0  ;;  %v372_v24 = vld [vmem:[#allocation2 + $0x120] sm:$0xff]  ;;  %v365_v27 = vld [vmem:[#allocation2 + $0xe8] sm:$0xff]  ;;  %v383_v51 = vld [vmem:[#allocation2 + $0x178] sm:$0xff] }
  0x2b   :  { %2265 = vmatprep.mubr.msk.f32.mxu0 %vm2550_vm0, %v3679_v0  ;;  %2262 = vmatpush3.msk.msra.mxu0 %vm253_vm4, %v166_v8  ;;  %v368_v26 = vld [vmem:[#allocation2 + $0x100] sm:$0xff]  ;;  %v361_v29 = vld [vmem:[#allocation2 + $0xc8] sm:$0xff]  ;;  %v382_v52 = vld [vmem:[#allocation2 + $0x170] sm:$0xff] }
  0x2c   :  { %2263 = vmatprep.subr.mxu0 %v3679_v0  ;;  %427 = vmatpush1.msra.mxu1 %v388_v16  ;;  %v364_v28 = vld [vmem:[#allocation2 + $0xe0] sm:$0xff]  ;;  %v357_v31 = vld [vmem:[#allocation2 + $0xa8] sm:$0xff]  ;;  %v379_v53 = vld [vmem:[#allocation2 + $0x158] sm:$0xff] }
  0x2d   :  { %2264 = vmatpush3.msra.mxu0 %v165_v9  ;;  %428 = vmatprep.subr.mxu1 %v385_v17  ;;  %v360_v30 = vld [vmem:[#allocation2 + $0xc0] sm:$0xff]  ;;  %v353_v33 = vld [vmem:[#allocation2 + $0x88] sm:$0xff]  ;;  %v378_v54 = vld [vmem:[#allocation2 + $0x150] sm:$0xff] }
  0x2e   :  { %493 = vmatprep.subr.mxu0 %v399_v11  ;;  %429 = vmatpush1.msra.mxu1 %v384_v18  ;;  %v356_v32 = vld [vmem:[#allocation2 + $0xa0] sm:$0xff]  ;;  %v349_v35 = vld [vmem:[#allocation2 + $0x68] sm:$0xff]  ;;  %v375_v55 = vld [vmem:[#allocation2 + $0x138] sm:$0xff] }
  0x2f   :  { %430 = vmatprep.subr.mxu1 %v381_v19  ;;  %v352_v34 = vld [vmem:[#allocation2 + $0x80] sm:$0xff]  ;;  %v374_v56 = vld [vmem:[#allocation2 + $0x130] sm:$0xff]  ;;  %v371_v57 = vld [vmem:[#allocation2 + $0x118] sm:$0xff] }
  0x30   :  { %431 = vmatpush1.msra.mxu1 %v380_v20  ;;  %v348_v36 = vld [vmem:[#allocation2 + $0x60] sm:$0xff]  ;;  %v370_v58 = vld [vmem:[#allocation2 + $0x110] sm:$0xff]  ;;  %v367_v59 = vld [vmem:[#allocation2 + $0xf8] sm:$0xff] }
  0x31   :  { %432 = vmatprep.subr.mxu1 %v377_v21  ;;  %v2210_v37 = vld [vmem:[%s3667_s5] ss:$0 sm:$0xff]  ;;  %v366_v60 = vld [vmem:[#allocation2 + $0xf0] sm:$0xff]  ;;  %v363_v61 = vld [vmem:[#allocation2 + $0xd8] sm:$0xff] }
  0x32   :  { %433 = vmatpush1.msra.mxu1 %v376_v22  ;;  %v362_v62 = vld [vmem:[#allocation2 + $0xd0] sm:$0xff]  ;;  %v359_v63 = vld [vmem:[#allocation2 + $0xb8] sm:$0xff]  ;;  %v345_v6 = vld [vmem:[#allocation2 + $0x48] sm:$0xff] }
  0x33   :  { %434 = vmatprep.subr.mxu1 %v373_v23  ;;  %v358_v1 = vld [vmem:[#allocation2 + $0xb0] sm:$0xff]  ;;  %v355_v2 = vld [vmem:[#allocation2 + $0x98] sm:$0xff]  ;;  %v344_v8 = vld [vmem:[#allocation2 + $0x40] sm:$0xff] }
  0x34   :  { %435 = vmatpush1.msra.mxu1 %v372_v24  ;;  %v354_v3 = vld [vmem:[#allocation2 + $0x90] sm:$0xff]  ;;  %v351_v4 = vld [vmem:[#allocation2 + $0x78] sm:$0xff]  ;;  %v341_v10 = vld [vmem:[#allocation2 + $0x28] sm:$0xff] }
  0x35   :  { %436 = vmatprep.subr.mxu1 %v369_v25  ;;  %v350_v5 = vld [vmem:[#allocation2 + $0x70] sm:$0xff]  ;;  %v347_v7 = vld [vmem:[#allocation2 + $0x58] sm:$0xff]  ;;  %v340_v12 = vld [vmem:[#allocation2 + $0x20] sm:$0xff] }
  0x36   :  { %437 = vmatpush1.msra.mxu1 %v368_v26  ;;  %v346_v9 = vld [vmem:[#allocation2 + $0x50] sm:$0xff]  ;;  %v343_v11 = vld [vmem:[#allocation2 + $0x38] sm:$0xff]  ;;  %v337_v14 = vld [vmem:[#allocation2 + $0x8] sm:$0xff] }
  0x37   :  { %438 = vmatprep.subr.mxu1 %v365_v27  ;;  %v342_v13 = vld [vmem:[#allocation2 + $0x30] sm:$0xff]  ;;  %v339_v15 = vld [vmem:[#allocation2 + $0x18] sm:$0xff]  ;;  %v336_v16 = vld [vmem:[#allocation2] sm:$0xff] }
  0x38   :  { %439 = vmatpush1.msra.mxu1 %v364_v28  ;;  %v338_v17 = vld [vmem:[#allocation2 + $0x10] sm:$0xff]  ;;  %v2693_v18 = vld [vmem:[#allocation5 + $0x1e8] sm:$0xff]  ;;  %v2695_v19 = vld [vmem:[#allocation5 + $0x1f8] sm:$0xff] }
  0x39   :  { %440 = vmatprep.subr.mxu1 %v361_v29  ;;  %3781 = vst [vmem:[#allocation14_spill] sm:$0xff] %v2693_v18  ;;  %3782 = vst [vmem:[#allocation15_spill] sm:$0xff] %v2695_v19  ;;  %v2216_v21 = vld [vmem:[%s3670_s8] ss:$0 sm:$0xff]  ;;  %v2705_v27 = vld [vmem:[#allocation5 + $0x1f0] sm:$0xff] }
  0x3a   :  { %441 = vmatpush1.msra.mxu1 %v360_v30  ;;  %v2703_v26 = vld [vmem:[#allocation5 + $0x1e0] sm:$0xff]  ;;  %v2707_v28 = vld [vmem:[#allocation5 + $0x1c8] sm:$0xff]  ;;  %v2709_v29 = vld [vmem:[#allocation5 + $0x1d8] sm:$0xff] }
  0x3b   :  { %442 = vmatprep.subr.mxu1 %v357_v31  ;;  %v2711_v30 = vld [vmem:[#allocation5 + $0x1c0] sm:$0xff]  ;;  %v2713_v31 = vld [vmem:[#allocation5 + $0x1d0] sm:$0xff] }
  0x3c   :  { %443 = vmatpush1.msra.mxu1 %v356_v32  ;;  %v2717_v32 = vld [vmem:[#allocation5 + $0x1a8] sm:$0xff] }
  0x3d   :  { %444 = vmatprep.subr.mxu1 %v353_v33  ;;  %v2719_v33 = vld [vmem:[#allocation5 + $0x1b8] sm:$0xff] }
  0x3e   :  { %445 = vmatpush1.msra.mxu1 %v352_v34  ;;  %v2723_v34 = vld [vmem:[#allocation5 + $0x1a0] sm:$0xff] }
  0x3f   :  { %446 = vmatprep.subr.mxu1 %v349_v35  ;;  %v2725_v35 = vld [vmem:[#allocation5 + $0x1b0] sm:$0xff] }
  0x40   :  { %447 = vmatpush1.msra.mxu1 %v348_v36  ;;  %v2729_v36 = vld [vmem:[#allocation5 + $0x188] sm:$0xff] }
  0x41   :  { %448 = vmatprep.subr.mxu1 %v345_v6  ;;  %v2827_v6 = vld [vmem:[#allocation5 + $0x98] sm:$0xff] }
  0x42   :  { %449 = vmatpush1.msra.mxu1 %v344_v8  ;;  %3785 = vst [vmem:[#allocation18_spill] sm:$0xff] %v2827_v6  ;;  %v2833_v8 = vld [vmem:[#allocation5 + $0x90] sm:$0xff] }
  0x43   :  { %450 = vmatprep.subr.mxu1 %v341_v10  ;;  %3787 = vst [vmem:[#allocation20_spill] sm:$0xff] %v2833_v8  ;;  %v2839_v10 = vld [vmem:[#allocation5 + $0x78] sm:$0xff] }
  0x44   :  { %451 = vmatpush1.msra.mxu1 %v340_v12  ;;  %3789 = vst [vmem:[#allocation22_spill] sm:$0xff] %v2839_v10  ;;  %v2845_v12 = vld [vmem:[#allocation5 + $0x70] sm:$0xff] }
  0x45   :  { %452 = vmatprep.subr.mxu1 %v337_v14  ;;  %3791 = vst [vmem:[#allocation24_spill] sm:$0xff] %v2845_v12  ;;  %v2851_v14 = vld [vmem:[#allocation5 + $0x58] sm:$0xff] }
  0x46   :  { %453 = vmatpush1.msra.mxu1 %v336_v16  ;;  %3793 = vst [vmem:[#allocation26_spill] sm:$0xff] %v2851_v14  ;;  %v2857_v16 = vld [vmem:[#allocation5 + $0x50] sm:$0xff] }
  0x47   :  { %630 = vmatprep.subr.mxu1 %v2693_v18  ;;  %3795 = vst [vmem:[#allocation28_spill] sm:$0xff] %v2857_v16 }
  0xe4   :  { %v160_v38 = vpop.f32.mrf.mxu0 }
  0xe5   :  { %v161_v39 = vadd.f32 %v2210_v37, %v160_v38  ;;  %v2731_v37 = vld [vmem:[#allocation5 + $0x198] sm:$0xff]  ;;  %v2735_v38 = vld [vmem:[#allocation5 + $0x180] sm:$0xff] }
  0xe6   :  { %v2251_v40 = vpop.f32.mrf.mxu0 }
  0xe7   :  { %v164_v41 = vmax.f32 %v161_v39, 0.0  ;;  %v2737_v39 = vld [vmem:[#allocation5 + $0x190] sm:$0xff]  ;;  %v2741_v40 = vld [vmem:[#allocation5 + $0x168] sm:$0xff] }
  0xe9   :  { %2266 = vmatmul.mubr.msk.f32.vlgmr.msra.gmra.mxu0 %vm249_vm5, %v164_v41  ;;  %v2743_v41 = vld [vmem:[#allocation5 + $0x178] sm:$0xff] }
  0xea   :  { %494 = vmatpush1.msra.mxu0 %v398_v42  ;;  %v2690_v46 = vpop.f32.mrf.mxu0  ;;  %557 = vmatprep.mubr.f32.mxu0 %v3679_v0  ;;  %v2747_v42 = vld [vmem:[#allocation5 + $0x160] sm:$0xff]  ;;  %v2883_v0 = vld [vmem:[#allocation5 + $0x10] sm:$0xff] }
  0xeb   :  { %495 = vmatprep.subr.mxu0 %v395_v43  ;;  %v2749_v43 = vld [vmem:[#allocation5 + $0x170] sm:$0xff]  ;;  %3803 = vst [vmem:[#allocation36_spill] sm:$0xff] %v2883_v0 }
  0xec   :  { %496 = vmatpush1.msra.mxu0 %v394_v44  ;;  %v2260_v49 = vpop.f32.mrf.mxu0  ;;  %v2753_v44 = vld [vmem:[#allocation5 + $0x148] sm:$0xff] }
  0xed   :  { %497 = vmatprep.subr.mxu0 %v391_v45  ;;  %v2755_v45 = vld [vmem:[#allocation5 + $0x158] sm:$0xff] }
  0xee   :  { %498 = vmatpush1.msra.mxu0 %v390_v47  ;;  %v2761_v47 = vld [vmem:[#allocation5 + $0x150] sm:$0xff]  ;;  %v2767_v49 = vld [vmem:[#allocation5 + $0x138] sm:$0xff] }
  0xef   :  { %499 = vmatprep.subr.mxu0 %v387_v48  ;;  %v2765_v48 = vld [vmem:[#allocation5 + $0x128] sm:$0xff] }
  0xf0   :  { %500 = vmatpush1.msra.mxu0 %v386_v50  ;;  %v2771_v50 = vld [vmem:[#allocation5 + $0x120] sm:$0xff] }
  0xf1   :  { %501 = vmatprep.subr.mxu0 %v383_v51  ;;  %v2773_v51 = vld [vmem:[#allocation5 + $0x130] sm:$0xff] }
  0xf2   :  { %502 = vmatpush1.msra.mxu0 %v382_v52  ;;  %v2777_v52 = vld [vmem:[#allocation5 + $0x108] sm:$0xff] }
  0xf3   :  { %503 = vmatprep.subr.mxu0 %v379_v53  ;;  %v2779_v53 = vld [vmem:[#allocation5 + $0x118] sm:$0xff] }
  0xf4   :  { %504 = vmatpush1.msra.mxu0 %v378_v54  ;;  %v2783_v54 = vld [vmem:[#allocation5 + $0x100] sm:$0xff] }
  0xf5   :  { %505 = vmatprep.subr.mxu0 %v375_v55  ;;  %v2785_v55 = vld [vmem:[#allocation5 + $0x110] sm:$0xff] }
  0xf6   :  { %506 = vmatpush1.msra.mxu0 %v374_v56  ;;  %v2789_v56 = vld [vmem:[#allocation5 + $0xe8] sm:$0xff] }
  0xf7   :  { %507 = vmatprep.subr.mxu0 %v371_v57  ;;  %v2791_v57 = vld [vmem:[#allocation5 + $0xf8] sm:$0xff] }
  0xf8   :  { %508 = vmatpush1.msra.mxu0 %v370_v58  ;;  %v2795_v58 = vld [vmem:[#allocation5 + $0xe0] sm:$0xff] }
  0xf9   :  { %509 = vmatprep.subr.mxu0 %v367_v59  ;;  %v2797_v59 = vld [vmem:[#allocation5 + $0xf0] sm:$0xff] }
  0xfa   :  { %510 = vmatpush1.msra.mxu0 %v366_v60  ;;  %v2801_v60 = vld [vmem:[#allocation5 + $0xc8] sm:$0xff] }
  0xfb   :  { %511 = vmatprep.subr.mxu0 %v363_v61  ;;  %v2803_v61 = vld [vmem:[#allocation5 + $0xd8] sm:$0xff] }
  0xfc   :  { %512 = vmatpush1.msra.mxu0 %v362_v62  ;;  %v2807_v62 = vld [vmem:[#allocation5 + $0xc0] sm:$0xff] }
  0xfd   :  { %513 = vmatprep.subr.mxu0 %v359_v63  ;;  %v2809_v63 = vld [vmem:[#allocation5 + $0xd0] sm:$0xff] }
  0xfe   :  { %514 = vmatpush1.msra.mxu0 %v358_v1  ;;  %v2813_v1 = vld [vmem:[#allocation5 + $0xa8] sm:$0xff] }
  0xff   :  { %515 = vmatprep.subr.mxu0 %v355_v2  ;;  %v2815_v2 = vld [vmem:[#allocation5 + $0xb8] sm:$0xff] }
 0x100   :  { %516 = vmatpush1.msra.mxu0 %v354_v3  ;;  %v2819_v3 = vld [vmem:[#allocation5 + $0xa0] sm:$0xff] }
 0x101   :  { %517 = vmatprep.subr.mxu0 %v351_v4  ;;  %v2821_v4 = vld [vmem:[#allocation5 + $0xb0] sm:$0xff] }
 0x102   :  { %518 = vmatpush1.msra.mxu0 %v350_v5  ;;  %3783 = vst [vmem:[#allocation16_spill] sm:$0xff] %v2821_v4  ;;  %v2825_v5 = vld [vmem:[#allocation5 + $0x88] sm:$0xff] }
 0x103   :  { %519 = vmatprep.subr.mxu0 %v347_v7  ;;  %3784 = vst [vmem:[#allocation17_spill] sm:$0xff] %v2825_v5  ;;  %v2831_v7 = vld [vmem:[#allocation5 + $0x80] sm:$0xff] }
 0x104   :  { %520 = vmatpush1.msra.mxu0 %v346_v9  ;;  %3786 = vst [vmem:[#allocation19_spill] sm:$0xff] %v2831_v7  ;;  %v2837_v9 = vld [vmem:[#allocation5 + $0x68] sm:$0xff] }
 0x105   :  { %521 = vmatprep.subr.mxu0 %v343_v11  ;;  %3788 = vst [vmem:[#allocation21_spill] sm:$0xff] %v2837_v9  ;;  %v2843_v11 = vld [vmem:[#allocation5 + $0x60] sm:$0xff] }
 0x106   :  { %522 = vmatpush1.msra.mxu0 %v342_v13  ;;  %3790 = vst [vmem:[#allocation23_spill] sm:$0xff] %v2843_v11  ;;  %v2849_v13 = vld [vmem:[#allocation5 + $0x48] sm:$0xff] }
 0x107   :  { %523 = vmatprep.subr.mxu0 %v339_v15  ;;  %3792 = vst [vmem:[#allocation25_spill] sm:$0xff] %v2849_v13  ;;  %v2855_v15 = vld [vmem:[#allocation5 + $0x40] sm:$0xff] }
 0x108   :  { %524 = vmatpush1.msra.mxu0 %v338_v17  ;;  %3794 = vst [vmem:[#allocation27_spill] sm:$0xff] %v2855_v15  ;;  %v2861_v17 = vld [vmem:[#allocation5 + $0x28] sm:$0xff] }
 0x109   :  { %701 = vmatprep.subr.mxu0 %v2695_v19  ;;  %3796 = vst [vmem:[#allocation29_spill] sm:$0xff] %v2861_v17 }
 0x1a9   :  { %v323_v20 = vpop.f32.mrf.mxu0 }
 0x1aa   :  { %v324_v22 = vadd.f32 %v323_v20, %v2690_v46  ;;  %v2759_v46 = vld [vmem:[#allocation5 + $0x140] sm:$0xff]  ;;  %v2863_v20 = vld [vmem:[#allocation5 + $0x38] sm:$0xff] }
 0x1ab   :  { %v2267_v23 = vpop.f32.mrf.mxu0  ;;  %3797 = vst [vmem:[#allocation30_spill] sm:$0xff] %v2863_v20 }
 0x1ac   :  { %v334_v24 = vadd.f32 %v2216_v21, %v324_v22  ;;  %v2867_v21 = vld [vmem:[#allocation5 + $0x20] sm:$0xff]  ;;  %v2869_v22 = vld [vmem:[#allocation5 + $0x30] sm:$0xff]  ;;  %v2873_v23 = vld [vmem:[#allocation5 + $0x8] sm:$0xff] }
 0x1ad   :  { %3798 = vst [vmem:[#allocation31_spill] sm:$0xff] %v2867_v21  ;;  %3799 = vst [vmem:[#allocation32_spill] sm:$0xff] %v2869_v22 }
 0x1ae   :  { %v335_v25 = vmax.f32 %v334_v24, 0.0  ;;  %3800 = vst [vmem:[#allocation33_spill] sm:$0xff] %v2873_v23  ;;  %v2875_v24 = vld [vmem:[#allocation5 + $0x18] sm:$0xff] }
 0x1af   :  { %3801 = vst [vmem:[#allocation34_spill] sm:$0xff] %v2875_v24 }
 0x1b0   :  { %487 = vmatmul.mubr.f32.vlgmr.msra.gmra.mxu1 %v335_v25  ;;  %558 = vmatmul.mubr.f32.vlgmr.msra.gmra.mxu0 %v335_v25  ;;  %v2879_v25 = vld [vmem:[#allocation5] sm:$0xff] }
 0x1b1   :  { %631 = vmatpush1.msra.mxu1 %v2703_v26  ;;  %702 = vmatpush1.msra.mxu0 %v2705_v27  ;;  %3802 = vst [vmem:[#allocation35_spill] sm:$0xff] %v2879_v25 }
 0x1b2   :  { %632 = vmatprep.subr.mxu1 %v2707_v28  ;;  %703 = vmatprep.subr.mxu0 %v2709_v29 }
 0x1b3   :  { %633 = vmatpush1.msra.mxu1 %v2711_v30  ;;  %704 = vmatpush1.msra.mxu0 %v2713_v31 }
 0x1b4   :  { %634 = vmatprep.subr.mxu1 %v2717_v32  ;;  %705 = vmatprep.subr.mxu0 %v2719_v33 }
 0x1b5   :  { %635 = vmatpush1.msra.mxu1 %v2723_v34  ;;  %706 = vmatpush1.msra.mxu0 %v2725_v35 }
 0x1b6   :  { %636 = vmatprep.subr.mxu1 %v2729_v36  ;;  %707 = vmatprep.subr.mxu0 %v2731_v37 }
 0x1b7   :  { %637 = vmatpush1.msra.mxu1 %v2735_v38  ;;  %708 = vmatpush1.msra.mxu0 %v2737_v39 }
 0x1b8   :  { %638 = vmatprep.subr.mxu1 %v2741_v40  ;;  %709 = vmatprep.subr.mxu0 %v2743_v41 }
 0x1b9   :  { %639 = vmatpush1.msra.mxu1 %v2747_v42  ;;  %710 = vmatpush1.msra.mxu0 %v2749_v43 }
 0x1ba   :  { %640 = vmatprep.subr.mxu1 %v2753_v44  ;;  %711 = vmatprep.subr.mxu0 %v2755_v45 }
 0x1bb   :  { %641 = vmatpush1.msra.mxu1 %v2759_v46  ;;  %712 = vmatpush1.msra.mxu0 %v2761_v47 }
 0x1bc   :  { %642 = vmatprep.subr.mxu1 %v2765_v48  ;;  %713 = vmatprep.subr.mxu0 %v2767_v49 }
 0x1bd   :  { %643 = vmatpush1.msra.mxu1 %v2771_v50  ;;  %714 = vmatpush1.msra.mxu0 %v2773_v51 }
 0x1be   :  { %644 = vmatprep.subr.mxu1 %v2777_v52  ;;  %715 = vmatprep.subr.mxu0 %v2779_v53 }
 0x1bf   :  { %645 = vmatpush1.msra.mxu1 %v2783_v54  ;;  %716 = vmatpush1.msra.mxu0 %v2785_v55 }
 0x1c0   :  { %646 = vmatprep.subr.mxu1 %v2789_v56  ;;  %717 = vmatprep.subr.mxu0 %v2791_v57 }
 0x1c1   :  { %647 = vmatpush1.msra.mxu1 %v2795_v58  ;;  %718 = vmatpush1.msra.mxu0 %v2797_v59 }
 0x1c2   :  { %648 = vmatprep.subr.mxu1 %v2801_v60  ;;  %719 = vmatprep.subr.mxu0 %v2803_v61 }
 0x1c3   :  { %649 = vmatpush1.msra.mxu1 %v2807_v62  ;;  %720 = vmatpush1.msra.mxu0 %v2809_v63 }
 0x1c4   :  { %650 = vmatprep.subr.mxu1 %v2813_v1  ;;  %721 = vmatprep.subr.mxu0 %v2815_v2 }
 0x1c5   :  { %651 = vmatpush1.msra.mxu1 %v2819_v3  ;;  %722 = vmatpush1.msra.mxu0 %v2821_v4 }
 0x1c6   :  { %652 = vmatprep.subr.mxu1 %v2825_v5  ;;  %723 = vmatprep.subr.mxu0 %v2827_v6 }
 0x1c7   :  { %653 = vmatpush1.msra.mxu1 %v2831_v7  ;;  %724 = vmatpush1.msra.mxu0 %v2833_v8 }
 0x1c8   :  { %654 = vmatprep.subr.mxu1 %v2837_v9  ;;  %725 = vmatprep.subr.mxu0 %v2839_v10 }
 0x1c9   :  { %655 = vmatpush1.msra.mxu1 %v2843_v11  ;;  %726 = vmatpush1.msra.mxu0 %v2845_v12 }
 0x1ca   :  { %656 = vmatprep.subr.mxu1 %v2849_v13  ;;  %727 = vmatprep.subr.mxu0 %v2851_v14 }
 0x1cb   :  { %657 = vmatpush1.msra.mxu1 %v2855_v15  ;;  %728 = vmatpush1.msra.mxu0 %v2857_v16  ;;  %v628_v16 = vld [vmem:[%s3664_s2] sm:$0x1] }
 0x1cc   :  { %658 = vmatprep.subr.mxu1 %v2861_v17  ;;  %729 = vmatprep.subr.mxu0 %v2863_v20  ;;  %v3804_v17 = vmov 0.0  }
 0x1cd   :  { %659 = vmatpush1.msra.mxu1 %v2867_v21  ;;  %730 = vmatpush1.msra.mxu0 %v2869_v22 }
 0x1ce   :  { %660 = vmatprep.subr.mxu1 %v2873_v23  ;;  %731 = vmatprep.subr.mxu0 %v2875_v24 }
 0x1cf   :  { %661 = vmatpush1.msra.mxu1 %v2879_v25  ;;  %694 = vmatprep.mubr.f32.mxu1 %v3804_v17 }
 0x1d0   :  { %732 = vmatpush1.msra.mxu0 %v2883_v0  ;;  %765 = vmatprep.mubr.f32.mxu0 %v3804_v17 }
 0x1d1   :  { %695 = vmatmul.mubr.f32.vlgmr.msra.gmra.mxu1 %v628_v16  ;;  %766 = vmatmul.mubr.f32.vlgmr.msra.gmra.mxu0 %v628_v16  ;;  %v3805_v16 = vld [vmem:[#allocation28_spill] sm:$0xff] }
 0x1d2   :  { %794 = vmatprep.subr.mxu1 %v2693_v18  ;;  %865 = vmatprep.subr.mxu0 %v2695_v19 }
 0x1d3   :  { %795 = vmatpush1.msra.mxu1 %v2703_v26  ;;  %866 = vmatpush1.msra.mxu0 %v2705_v27 }
 0x1d4   :  { %796 = vmatprep.subr.mxu1 %v2707_v28  ;;  %867 = vmatprep.subr.mxu0 %v2709_v29 }
 0x1d5   :  { %797 = vmatpush1.msra.mxu1 %v2711_v30  ;;  %868 = vmatpush1.msra.mxu0 %v2713_v31 }
 0x1d6   :  { %798 = vmatprep.subr.mxu1 %v2717_v32  ;;  %869 = vmatprep.subr.mxu0 %v2719_v33 }
 0x1d7   :  { %799 = vmatpush1.msra.mxu1 %v2723_v34  ;;  %870 = vmatpush1.msra.mxu0 %v2725_v35 }
 0x1d8   :  { %800 = vmatprep.subr.mxu1 %v2729_v36  ;;  %871 = vmatprep.subr.mxu0 %v2731_v37 }
 0x1d9   :  { %801 = vmatpush1.msra.mxu1 %v2735_v38  ;;  %872 = vmatpush1.msra.mxu0 %v2737_v39 }
 0x1da   :  { %802 = vmatprep.subr.mxu1 %v2741_v40  ;;  %873 = vmatprep.subr.mxu0 %v2743_v41 }
 0x1db   :  { %803 = vmatpush1.msra.mxu1 %v2747_v42  ;;  %874 = vmatpush1.msra.mxu0 %v2749_v43 }
 0x1dc   :  { %804 = vmatprep.subr.mxu1 %v2753_v44  ;;  %875 = vmatprep.subr.mxu0 %v2755_v45 }
 0x1dd   :  { %805 = vmatpush1.msra.mxu1 %v2759_v46  ;;  %876 = vmatpush1.msra.mxu0 %v2761_v47 }
 0x1de   :  { %806 = vmatprep.subr.mxu1 %v2765_v48  ;;  %877 = vmatprep.subr.mxu0 %v2767_v49 }
 0x1df   :  { %807 = vmatpush1.msra.mxu1 %v2771_v50  ;;  %878 = vmatpush1.msra.mxu0 %v2773_v51 }
 0x1e0   :  { %808 = vmatprep.subr.mxu1 %v2777_v52  ;;  %879 = vmatprep.subr.mxu0 %v2779_v53 }
 0x1e1   :  { %809 = vmatpush1.msra.mxu1 %v2783_v54  ;;  %880 = vmatpush1.msra.mxu0 %v2785_v55 }
 0x1e2   :  { %810 = vmatprep.subr.mxu1 %v2789_v56  ;;  %881 = vmatprep.subr.mxu0 %v2791_v57 }
 0x1e3   :  { %811 = vmatpush1.msra.mxu1 %v2795_v58  ;;  %882 = vmatpush1.msra.mxu0 %v2797_v59 }
 0x1e4   :  { %812 = vmatprep.subr.mxu1 %v2801_v60  ;;  %883 = vmatprep.subr.mxu0 %v2803_v61 }
 0x1e5   :  { %813 = vmatpush1.msra.mxu1 %v2807_v62  ;;  %884 = vmatpush1.msra.mxu0 %v2809_v63 }
 0x1e6   :  { %814 = vmatprep.subr.mxu1 %v2813_v1  ;;  %885 = vmatprep.subr.mxu0 %v2815_v2 }
 0x1e7   :  { %815 = vmatpush1.msra.mxu1 %v2819_v3  ;;  %886 = vmatpush1.msra.mxu0 %v2821_v4 }
 0x1e8   :  { %816 = vmatprep.subr.mxu1 %v2825_v5  ;;  %887 = vmatprep.subr.mxu0 %v2827_v6  ;;  %v3806_v6 = vld [vmem:[#allocation29_spill] sm:$0xff] }
 0x1e9   :  { %817 = vmatpush1.msra.mxu1 %v2831_v7  ;;  %888 = vmatpush1.msra.mxu0 %v2833_v8 }
 0x1ea   :  { %818 = vmatprep.subr.mxu1 %v2837_v9  ;;  %889 = vmatprep.subr.mxu0 %v2839_v10 }
 0x1eb   :  { %819 = vmatpush1.msra.mxu1 %v2843_v11  ;;  %890 = vmatpush1.msra.mxu0 %v2845_v12 }
 0x1ec   :  { %820 = vmatprep.subr.mxu1 %v2849_v13  ;;  %891 = vmatprep.subr.mxu0 %v2851_v14 }
 0x1ed   :  { %821 = vmatpush1.msra.mxu1 %v2855_v15  ;;  %892 = vmatpush1.msra.mxu0 %v3805_v16 }
 0x1ee   :  { %822 = vmatprep.subr.mxu1 %v3806_v6  ;;  %893 = vmatprep.subr.mxu0 %v2863_v20  ;;  %v402_v20 = vlaneseq }
 0x1ef   :  { %823 = vmatpush1.msra.mxu1 %v2867_v21  ;;  %894 = vmatpush1.msra.mxu0 %v2869_v22 }
 0x1f0   :  { %824 = vmatprep.subr.mxu1 %v2873_v23  ;;  %895 = vmatprep.subr.mxu0 %v2875_v24  ;;  %v403_v21 = vshrl.u32 %v402_v20, 7  ;;  %v400_v23 = vld [vmem:[%s3673_s11] sm:$0xf] }
 0x1f1   :  { %825 = vmatpush1.msra.mxu1 %v2879_v25  ;;  %858 = vmatprep.mubr.f32.mxu1 %v3804_v17 }
 0x1f2   :  { %896 = vmatpush1.msra.mxu0 %v2883_v0  ;;  %929 = vmatprep.mubr.f32.mxu0 %v3804_v17  ;;  %v404_v6 = vsub.s32 0, %v403_v21  ;;  %v408_v24 = vsub.s32 1, %v403_v21  ;;  %v412_v16 = vsub.s32 2, %v403_v21  ;;  %v416_v10 = vsub.s32 3, %v403_v21 }
 0x1f3   :  { %976 = vmatprep.subr.mxu1 %v2693_v18  ;;  %1047 = vmatprep.subr.mxu0 %v2695_v19 }
 0x1f4   :  { %v405_v25 = vrot.slane %v400_v23, %v404_v6  ;;  %v409_v15 = vrot.slane %v400_v23, %v408_v24  ;;  %v413_v18 = vrot.slane %v400_v23, %v412_v16  ;;  %v417_v5 = vrot.slane %v400_v23, %v416_v10 }
 0x270   :  { %v488_v22 = vpop.f32.mrf.mxu1  ;;  %v559_v14 = vpop.f32.mrf.mxu0 }
 0x271   :  { %v2965_v13 = vadd.f32 %v488_v22, %v405_v25  ;;  %v2971_v6 = vadd.f32 %v559_v14, %v413_v18  ;;  %v629_v18 = vld [vmem:[%s3665_s3] sm:$0x1] }
 0x272   :  { %v490_v0 = vpop.f32.mrf.mxu1  ;;  %v561_v19 = vpop.f32.mrf.mxu0 }
 0x273   :  { %v2967_v12 = vadd.f32 %v490_v0, %v409_v15  ;;  %v2974_v0 = vadd.f32 %v561_v19, %v417_v5 }
 0x275   :  { %3807 = vst [vmem:[#allocation37_spill] sm:$0xff] %v2967_v12 }
 0x291   :  { %v696_v17 = vpop.f32.mrf.mxu1  ;;  %v767_v7 = vpop.f32.mrf.mxu0 }
 0x292   :  { %v772_v20 = vadd.f32 %v696_v17, %v2965_v13  ;;  %v774_v22 = vadd.f32 %v767_v7, %v2971_v6 }
 0x293   :  { %v698_v11 = vpop.f32.mrf.mxu1  ;;  %v769_v25 = vpop.f32.mrf.mxu0 }
 0x294   :  { %v776_v9 = vmul.f32 0.5, %v772_v20  ;;  %v773_v8 = vadd.f32 %v698_v11, %v2967_v12  ;;  %v775_v15 = vadd.f32 %v769_v25, %v2974_v0  ;;  %v3810_v25 = vld [vmem:[#allocation18_spill] sm:$0xff] }
 0x296   :  { %2311 = vtanh.f32 %v776_v9  ;;  %v780_v24 = vmul.f32 0.5, %v773_v8  ;;  %v785_v17 = vmul.f32 0.5, %v775_v15  ;;  %v3811_v15 = vld [vmem:[#allocation19_spill] sm:$0xff] }
 0x298   :  { %2313 = vtanh.f32 %v780_v24 }
 0x299   :  { %2315 = vtanh.f32 %v774_v22 }
 0x29a   :  { %2317 = vtanh.f32 %v785_v17  ;;  %v3812_v17 = vld [vmem:[#allocation20_spill] sm:$0xff] }
 0x2a3   :  { %v2312_v21 = vpop.eup %2311 }
 0x2a4   :  { %v778_v16 = vmul.f32 0.5, %v2312_v21  ;;  %v3813_v21 = vld [vmem:[#allocation21_spill] sm:$0xff] }
 0x2a5   :  { %v2314_v20 = vpop.eup %2313 }
 0x2a6   :  { %v779_v11 = vadd.f32 0.5, %v778_v16  ;;  %v782_v12 = vmul.f32 0.5, %v2314_v20  ;;  %v2316_v7 = vpop.eup %2315  ;;  %v3814_v16 = vld [vmem:[#allocation22_spill] sm:$0xff]  ;;  %v3815_v20 = vld [vmem:[#allocation23_spill] sm:$0xff] }
 0x2a7   :  { %v2318_v5 = vpop.eup %2317 }
 0x2a8   :  { %v783_v8 = vadd.f32 0.5, %v782_v12  ;;  %v790_v10 = vmul.f32 %v2316_v7, %v779_v11  ;;  %v787_v14 = vmul.f32 0.5, %v2318_v5  ;;  %v3809_v12 = vld [vmem:[#allocation17_spill] sm:$0xff]  ;;  %v3816_v11 = vld [vmem:[#allocation24_spill] sm:$0xff]  ;;  %v3819_v7 = vld [vmem:[#allocation27_spill] sm:$0xff] }
 0x2a9   :  { %v3822_v5 = vld [vmem:[#allocation30_spill] sm:$0xff] }
 0x2aa   :  { %v789_v9 = vmul.f32 %v783_v8, %v629_v18  ;;  %v788_v23 = vadd.f32 0.5, %v787_v14  ;;  %v3817_v18 = vld [vmem:[#allocation25_spill] sm:$0xff]  ;;  %v3818_v8 = vld [vmem:[#allocation26_spill] sm:$0xff]  ;;  %v3823_v14 = vld [vmem:[#allocation31_spill] sm:$0xff] }
 0x2ac   :  { %v2980_v19 = vadd.f32 %v790_v10, %v789_v9  ;;  %v3820_v9 = vld [vmem:[#allocation28_spill] sm:$0xff]  ;;  %v3821_v10 = vld [vmem:[#allocation29_spill] sm:$0xff] }
 0x2ae   :  { %2319 = vtanh.f32 %v2980_v19 }
 0x2bb   :  { %v2320_v24 = vpop.eup %2319 }
 0x2bc   :  { %v2983_v22 = vmul.f32 %v2320_v24, %v788_v23  ;;  %v3824_v23 = vld [vmem:[#allocation32_spill] sm:$0xff]  ;;  %v3825_v24 = vld [vmem:[#allocation33_spill] sm:$0xff] }
 0x2be   :  { %3808 = vst [vmem:[#allocation38_spill] sm:$0xff] %v2983_v22  ;;  %859 = vmatmul.mubr.f32.vlgmr.msra.gmra.mxu1 %v2983_v22  ;;  %930 = vmatmul.mubr.f32.vlgmr.msra.gmra.mxu0 %v2983_v22  ;;  %v3826_v22 = vld [vmem:[#allocation34_spill] sm:$0xff] }
 0x2bf   :  { %977 = vmatpush1.msra.mxu1 %v2703_v26  ;;  %1048 = vmatpush1.msra.mxu0 %v2705_v27 }
 0x2c0   :  { %978 = vmatprep.subr.mxu1 %v2707_v28  ;;  %1049 = vmatprep.subr.mxu0 %v2709_v29 }
 0x2c1   :  { %979 = vmatpush1.msra.mxu1 %v2711_v30  ;;  %1050 = vmatpush1.msra.mxu0 %v2713_v31 }
 0x2c2   :  { %980 = vmatprep.subr.mxu1 %v2717_v32  ;;  %1051 = vmatprep.subr.mxu0 %v2719_v33 }
 0x2c3   :  { %981 = vmatpush1.msra.mxu1 %v2723_v34  ;;  %1052 = vmatpush1.msra.mxu0 %v2725_v35 }
 0x2c4   :  { %982 = vmatprep.subr.mxu1 %v2729_v36  ;;  %1053 = vmatprep.subr.mxu0 %v2731_v37 }
 0x2c5   :  { %983 = vmatpush1.msra.mxu1 %v2735_v38  ;;  %1054 = vmatpush1.msra.mxu0 %v2737_v39 }
 0x2c6   :  { %984 = vmatprep.subr.mxu1 %v2741_v40  ;;  %1055 = vmatprep.subr.mxu0 %v2743_v41 }
 0x2c7   :  { %985 = vmatpush1.msra.mxu1 %v2747_v42  ;;  %1056 = vmatpush1.msra.mxu0 %v2749_v43 }
 0x2c8   :  { %986 = vmatprep.subr.mxu1 %v2753_v44  ;;  %1057 = vmatprep.subr.mxu0 %v2755_v45 }
 0x2c9   :  { %987 = vmatpush1.msra.mxu1 %v2759_v46  ;;  %1058 = vmatpush1.msra.mxu0 %v2761_v47 }
 0x2ca   :  { %988 = vmatprep.subr.mxu1 %v2765_v48  ;;  %1059 = vmatprep.subr.mxu0 %v2767_v49 }
 0x2cb   :  { %989 = vmatpush1.msra.mxu1 %v2771_v50  ;;  %1060 = vmatpush1.msra.mxu0 %v2773_v51 }
 0x2cc   :  { %990 = vmatprep.subr.mxu1 %v2777_v52  ;;  %1061 = vmatprep.subr.mxu0 %v2779_v53 }
 0x2cd   :  { %991 = vmatpush1.msra.mxu1 %v2783_v54  ;;  %1062 = vmatpush1.msra.mxu0 %v2785_v55 }
 0x2ce   :  { %992 = vmatprep.subr.mxu1 %v2789_v56  ;;  %1063 = vmatprep.subr.mxu0 %v2791_v57 }
 0x2cf   :  { %993 = vmatpush1.msra.mxu1 %v2795_v58  ;;  %1064 = vmatpush1.msra.mxu0 %v2797_v59 }
 0x2d0   :  { %994 = vmatprep.subr.mxu1 %v2801_v60  ;;  %1065 = vmatprep.subr.mxu0 %v2803_v61 }
 0x2d1   :  { %995 = vmatpush1.msra.mxu1 %v2807_v62  ;;  %1066 = vmatpush1.msra.mxu0 %v2809_v63 }
 0x2d2   :  { %996 = vmatprep.subr.mxu1 %v2813_v1  ;;  %1067 = vmatprep.subr.mxu0 %v2815_v2 }
 0x2d3   :  { %997 = vmatpush1.msra.mxu1 %v2819_v3  ;;  %1068 = vmatpush1.msra.mxu0 %v2821_v4 }
 0x2d4   :  { %998 = vmatprep.subr.mxu1 %v3809_v12  ;;  %1069 = vmatprep.subr.mxu0 %v3810_v25 }
 0x2d5   :  { %999 = vmatpush1.msra.mxu1 %v3811_v15  ;;  %1070 = vmatpush1.msra.mxu0 %v3812_v17 }
 0x2d6   :  { %1000 = vmatprep.subr.mxu1 %v3813_v21  ;;  %1071 = vmatprep.subr.mxu0 %v3814_v16 }
 0x2d7   :  { %1001 = vmatpush1.msra.mxu1 %v3815_v20  ;;  %1072 = vmatpush1.msra.mxu0 %v3816_v11  ;;  %v3827_v11 = vld [vmem:[#allocation35_spill] sm:$0xff] }
 0x2d8   :  { %1002 = vmatprep.subr.mxu1 %v3817_v18  ;;  %1073 = vmatprep.subr.mxu0 %v3818_v8  ;;  %v3828_v18 = vmov 0.0   ;;  %v3829_v8 = vld [vmem:[#allocation36_spill] sm:$0xff] }
 0x2d9   :  { %1003 = vmatpush1.msra.mxu1 %v3819_v7  ;;  %1074 = vmatpush1.msra.mxu0 %v3820_v9  ;;  %v3830_v9 = vld [vmem:[#allocation14_spill] sm:$0xff] }
 0x2da   :  { %1004 = vmatprep.subr.mxu1 %v3821_v10  ;;  %1075 = vmatprep.subr.mxu0 %v3822_v5  ;;  %v3831_v10 = vld [vmem:[#allocation15_spill] sm:$0xff] }
 0x2db   :  { %1005 = vmatpush1.msra.mxu1 %v3823_v14  ;;  %1076 = vmatpush1.msra.mxu0 %v3824_v23 }
 0x2dc   :  { %1006 = vmatprep.subr.mxu1 %v3825_v24  ;;  %1077 = vmatprep.subr.mxu0 %v3826_v22 }
 0x2dd   :  { %1007 = vmatpush1.msra.mxu1 %v3827_v11  ;;  %1040 = vmatprep.mubr.f32.mxu1 %v3828_v18  ;;  %v3832_v11 = vld [vmem:[#allocation37_spill] sm:$0xff] }
 0x2de   :  { %1078 = vmatpush1.msra.mxu0 %v3829_v8  ;;  %1111 = vmatprep.mubr.f32.mxu0 %v3828_v18 }
 0x2df   :  { %1158 = vmatprep.subr.mxu1 %v3830_v9  ;;  %1229 = vmatprep.subr.mxu0 %v3831_v10 }
 0x37e   :  { %v860_v5 = vpop.f32.mrf.mxu1  ;;  %v931_v7 = vpop.f32.mrf.mxu0 }
 0x37f   :  { %v940_v14 = vrot.slane %v860_v5, 7  ;;  %v942_v16 = vrot.slane %v931_v7, 7 }
 0x380   :  { %v862_v23 = vpop.f32.mrf.mxu1  ;;  %v933_v8 = vpop.f32.mrf.mxu0 }
 0x381   :  { %v948_v24 = vadd.f32 %v940_v14, %v2965_v13  ;;  %v941_v20 = vrot.slane %v862_v23, 7  ;;  %v950_v18 = vadd.f32 %v942_v16, %v2971_v6  ;;  %v943_v9 = vrot.slane %v933_v8, 7 }
 0x383   :  { %v952_v22 = vmul.f32 0.5, %v948_v24  ;;  %v949_v21 = vadd.f32 %v941_v20, %v3832_v11  ;;  %v951_v10 = vadd.f32 %v943_v9, %v2974_v0  ;;  %v966_v20 = vrot.slane %v2980_v19, 7  ;;  %v3833_v19 = vld [vmem:[#allocation17_spill] sm:$0xff] }
 0x385   :  { %2321 = vtanh.f32 %v952_v22  ;;  %v956_v17 = vmul.f32 0.5, %v949_v21  ;;  %v961_v5 = vmul.f32 0.5, %v951_v10  ;;  %v3836_v10 = vld [vmem:[#allocation20_spill] sm:$0xff] }
 0x387   :  { %2323 = vtanh.f32 %v956_v17 }
 0x388   :  { %2325 = vtanh.f32 %v950_v18 }
 0x389   :  { %2327 = vtanh.f32 %v961_v5  ;;  %v3837_v5 = vld [vmem:[#allocation21_spill] sm:$0xff] }
 0x392   :  { %v2322_v15 = vpop.eup %2321 }
 0x393   :  { %v954_v25 = vmul.f32 0.5, %v2322_v15  ;;  %v3835_v15 = vld [vmem:[#allocation19_spill] sm:$0xff] }
 0x394   :  { %v2324_v12 = vpop.eup %2323 }
 0x395   :  { %v955_v14 = vadd.f32 0.5, %v954_v25  ;;  %v958_v23 = vmul.f32 0.5, %v2324_v12  ;;  %v2326_v22 = vpop.eup %2325  ;;  %v3834_v12 = vld [vmem:[#allocation18_spill] sm:$0xff] }
 0x396   :  { %v2328_v17 = vpop.eup %2327 }
 0x397   :  { %v959_v7 = vadd.f32 0.5, %v958_v23  ;;  %v969_v24 = vmul.f32 %v2326_v22, %v955_v14  ;;  %v963_v16 = vmul.f32 0.5, %v2328_v17  ;;  %v3838_v14 = vld [vmem:[#allocation22_spill] sm:$0xff]  ;;  %v3839_v23 = vld [vmem:[#allocation23_spill] sm:$0xff]  ;;  %v3845_v17 = vld [vmem:[#allocation29_spill] sm:$0xff] }
 0x398   :  { %v3842_v22 = vld [vmem:[#allocation26_spill] sm:$0xff] }
 0x399   :  { %v968_v21 = vmul.f32 %v966_v20, %v959_v7  ;;  %v964_v18 = vadd.f32 0.5, %v963_v16  ;;  %v3840_v7 = vld [vmem:[#allocation24_spill] sm:$0xff]  ;;  %v3841_v20 = vld [vmem:[#allocation25_spill] sm:$0xff]  ;;  %v3846_v16 = vld [vmem:[#allocation30_spill] sm:$0xff] }
 0x39b   :  { %v3058_v11 = vadd.f32 %v969_v24, %v968_v21  ;;  %v3843_v21 = vld [vmem:[#allocation27_spill] sm:$0xff]  ;;  %v3844_v24 = vld [vmem:[#allocation28_spill] sm:$0xff] }
 0x39d   :  { %2329 = vtanh.f32 %v3058_v11 }
 0x3aa   :  { %v2330_v8 = vpop.eup %2329 }
 0x3ab   :  { %v3061_v9 = vmul.f32 %v2330_v8, %v964_v18  ;;  %v3847_v18 = vld [vmem:[#allocation31_spill] sm:$0xff]  ;;  %v3848_v8 = vld [vmem:[#allocation32_spill] sm:$0xff] }
 0x3ad   :  { %v974_v25 = vrot.slane %v3061_v9, 1 }
 0x3af   :  { %1041 = vmatmul.mubr.f32.vlgmr.msra.gmra.mxu1 %v974_v25  ;;  %1112 = vmatmul.mubr.f32.vlgmr.msra.gmra.mxu0 %v974_v25  ;;  %v3849_v25 = vld [vmem:[#allocation33_spill] sm:$0xff] }
 0x3b0   :  { %1159 = vmatpush1.msra.mxu1 %v2703_v26  ;;  %1230 = vmatpush1.msra.mxu0 %v2705_v27 }
 0x3b1   :  { %1160 = vmatprep.subr.mxu1 %v2707_v28  ;;  %1231 = vmatprep.subr.mxu0 %v2709_v29 }
 0x3b2   :  { %1161 = vmatpush1.msra.mxu1 %v2711_v30  ;;  %1232 = vmatpush1.msra.mxu0 %v2713_v31 }
 0x3b3   :  { %1162 = vmatprep.subr.mxu1 %v2717_v32  ;;  %1233 = vmatprep.subr.mxu0 %v2719_v33 }
 0x3b4   :  { %1163 = vmatpush1.msra.mxu1 %v2723_v34  ;;  %1234 = vmatpush1.msra.mxu0 %v2725_v35 }
 0x3b5   :  { %1164 = vmatprep.subr.mxu1 %v2729_v36  ;;  %1235 = vmatprep.subr.mxu0 %v2731_v37 }
 0x3b6   :  { %1165 = vmatpush1.msra.mxu1 %v2735_v38  ;;  %1236 = vmatpush1.msra.mxu0 %v2737_v39 }
 0x3b7   :  { %1166 = vmatprep.subr.mxu1 %v2741_v40  ;;  %1237 = vmatprep.subr.mxu0 %v2743_v41 }
 0x3b8   :  { %1167 = vmatpush1.msra.mxu1 %v2747_v42  ;;  %1238 = vmatpush1.msra.mxu0 %v2749_v43 }
 0x3b9   :  { %1168 = vmatprep.subr.mxu1 %v2753_v44  ;;  %1239 = vmatprep.subr.mxu0 %v2755_v45 }
 0x3ba   :  { %1169 = vmatpush1.msra.mxu1 %v2759_v46  ;;  %1240 = vmatpush1.msra.mxu0 %v2761_v47 }
 0x3bb   :  { %1170 = vmatprep.subr.mxu1 %v2765_v48  ;;  %1241 = vmatprep.subr.mxu0 %v2767_v49 }
 0x3bc   :  { %1171 = vmatpush1.msra.mxu1 %v2771_v50  ;;  %1242 = vmatpush1.msra.mxu0 %v2773_v51 }
 0x3bd   :  { %1172 = vmatprep.subr.mxu1 %v2777_v52  ;;  %1243 = vmatprep.subr.mxu0 %v2779_v53 }
 0x3be   :  { %1173 = vmatpush1.msra.mxu1 %v2783_v54  ;;  %1244 = vmatpush1.msra.mxu0 %v2785_v55 }
 0x3bf   :  { %1174 = vmatprep.subr.mxu1 %v2789_v56  ;;  %1245 = vmatprep.subr.mxu0 %v2791_v57 }
 0x3c0   :  { %1175 = vmatpush1.msra.mxu1 %v2795_v58  ;;  %1246 = vmatpush1.msra.mxu0 %v2797_v59 }
 0x3c1   :  { %1176 = vmatprep.subr.mxu1 %v2801_v60  ;;  %1247 = vmatprep.subr.mxu0 %v2803_v61 }
 0x3c2   :  { %1177 = vmatpush1.msra.mxu1 %v2807_v62  ;;  %1248 = vmatpush1.msra.mxu0 %v2809_v63 }
 0x3c3   :  { %1178 = vmatprep.subr.mxu1 %v2813_v1  ;;  %1249 = vmatprep.subr.mxu0 %v2815_v2 }
 0x3c4   :  { %1179 = vmatpush1.msra.mxu1 %v2819_v3  ;;  %1250 = vmatpush1.msra.mxu0 %v2821_v4 }
 0x3c5   :  { %1180 = vmatprep.subr.mxu1 %v3833_v19  ;;  %1251 = vmatprep.subr.mxu0 %v3834_v12 }
 0x3c6   :  { %1181 = vmatpush1.msra.mxu1 %v3835_v15  ;;  %1252 = vmatpush1.msra.mxu0 %v3836_v10 }
 0x3c7   :  { %1182 = vmatprep.subr.mxu1 %v3837_v5  ;;  %1253 = vmatprep.subr.mxu0 %v3838_v14 }
 0x3c8   :  { %1183 = vmatpush1.msra.mxu1 %v3839_v23  ;;  %1254 = vmatpush1.msra.mxu0 %v3840_v7  ;;  %v3850_v23 = vld [vmem:[#allocation34_spill] sm:$0xff]  ;;  %v3851_v7 = vld [vmem:[#allocation35_spill] sm:$0xff] }
 0x3c9   :  { %1184 = vmatprep.subr.mxu1 %v3841_v20  ;;  %1255 = vmatprep.subr.mxu0 %v3842_v22  ;;  %v3852_v20 = vmov 0.0   ;;  %v3853_v22 = vld [vmem:[#allocation36_spill] sm:$0xff] }
 0x3ca   :  { %1185 = vmatpush1.msra.mxu1 %v3843_v21  ;;  %1256 = vmatpush1.msra.mxu0 %v3844_v24  ;;  %v3854_v24 = vld [vmem:[#allocation14_spill] sm:$0xff] }
 0x3cb   :  { %1186 = vmatprep.subr.mxu1 %v3845_v17  ;;  %1257 = vmatprep.subr.mxu0 %v3846_v16  ;;  %v3855_v17 = vld [vmem:[#allocation15_spill] sm:$0xff] }
 0x3cc   :  { %1187 = vmatpush1.msra.mxu1 %v3847_v18  ;;  %1258 = vmatpush1.msra.mxu0 %v3848_v8 }
 0x3cd   :  { %1188 = vmatprep.subr.mxu1 %v3849_v25  ;;  %1259 = vmatprep.subr.mxu0 %v3850_v23 }
 0x3ce   :  { %1189 = vmatpush1.msra.mxu1 %v3851_v7  ;;  %1222 = vmatprep.mubr.f32.mxu1 %v3852_v20  ;;  %v3856_v7 = vld [vmem:[#allocation37_spill] sm:$0xff] }
 0x3cf   :  { %1260 = vmatpush1.msra.mxu0 %v3853_v22  ;;  %1293 = vmatprep.mubr.f32.mxu0 %v3852_v20 }
 0x3d0   :  { %1340 = vmatprep.subr.mxu1 %v3854_v24  ;;  %1411 = vmatprep.subr.mxu0 %v3855_v17 }
 0x46f   :  { %v1042_v16 = vpop.f32.mrf.mxu1  ;;  %v1113_v21 = vpop.f32.mrf.mxu0 }
 0x470   :  { %v1122_v18 = vrot.slane %v1042_v16, 6  ;;  %v1124_v5 = vrot.slane %v1113_v21, 6 }
 0x471   :  { %v1044_v8 = vpop.f32.mrf.mxu1  ;;  %v1115_v22 = vpop.f32.mrf.mxu0 }
 0x472   :  { %v1130_v25 = vadd.f32 %v1122_v18, %v2965_v13  ;;  %v1123_v14 = vrot.slane %v1044_v8, 6  ;;  %v1132_v20 = vadd.f32 %v1124_v5, %v2971_v6  ;;  %v1125_v24 = vrot.slane %v1115_v22, 6 }
 0x474   :  { %v1134_v23 = vmul.f32 0.5, %v1130_v25  ;;  %v1131_v10 = vadd.f32 %v1123_v14, %v3856_v7  ;;  %v1133_v17 = vadd.f32 %v1125_v24, %v2974_v0  ;;  %v1148_v14 = vrot.slane %v3058_v11, 7 }
 0x476   :  { %2331 = vtanh.f32 %v1134_v23  ;;  %v1138_v15 = vmul.f32 0.5, %v1131_v10  ;;  %v1143_v16 = vmul.f32 0.5, %v1133_v17 }
 0x478   :  { %2333 = vtanh.f32 %v1138_v15 }
 0x479   :  { %2335 = vtanh.f32 %v1132_v20 }
 0x47a   :  { %2337 = vtanh.f32 %v1143_v16 }
 0x483   :  { %v2332_v12 = vpop.eup %2331 }
 0x484   :  { %v1136_v19 = vmul.f32 0.5, %v2332_v12 }
 0x485   :  { %v2334_v4 = vpop.eup %2333 }
 0x486   :  { %v1137_v18 = vadd.f32 0.5, %v1136_v19  ;;  %v1140_v8 = vmul.f32 0.5, %v2334_v4  ;;  %v2336_v23 = vpop.eup %2335  ;;  %v3857_v19 = vld [vmem:[#allocation38_spill] sm:$0xff] }
 0x487   :  { %v2338_v15 = vpop.eup %2337  ;;  %v2068_v4 = vsel %vm2067_vm6, %v3857_v19, %v3061_v9 }
 0x488   :  { %v1141_v21 = vadd.f32 0.5, %v1140_v8  ;;  %v1151_v25 = vmul.f32 %v2336_v23, %v1137_v18  ;;  %v1145_v5 = vmul.f32 0.5, %v2338_v15 }
 0x48a   :  { %v1150_v10 = vmul.f32 %v1148_v14, %v1141_v21  ;;  %v1146_v20 = vadd.f32 0.5, %v1145_v5 }
 0x48c   :  { %v3135_v7 = vadd.f32 %v1151_v25, %v1150_v10 }
 0x48e   :  { %2339 = vtanh.f32 %v3135_v7  ;;  %v1330_v21 = vrot.slane %v3135_v7, 7  ;;  %v3224_v7 = vld [vmem:[#allocation5 + $0x1e0] sm:$0xff] }
 0x49b   :  { %v2340_v22 = vpop.eup %2339 }
 0x49c   :  { %v1154_v12 = vmul.f32 %v2340_v22, %v1146_v20 }
 0x49e   :  { %v1156_v24 = vrot.slane %v1154_v12, 2  ;;  %v3141_v17 = vsel %vm253_vm4, %v2068_v4, %v1154_v12 }
 0x4a0   :  { %1223 = vmatmul.mubr.f32.vlgmr.msra.gmra.mxu1 %v1156_v24  ;;  %1294 = vmatmul.mubr.f32.vlgmr.msra.gmra.mxu0 %v1156_v24  ;;  %v3227_v24 = vld [vmem:[#allocation5 + $0x1f0] sm:$0xff] }
 0x4a1   :  { %1341 = vmatpush1.msra.mxu1 %v2703_v26  ;;  %1412 = vmatpush1.msra.mxu0 %v2705_v27  ;;  %v3858_v26 = vld [vmem:[#allocation16_spill] sm:$0xff]  ;;  %v3859_v27 = vld [vmem:[#allocation17_spill] sm:$0xff] }
 0x4a2   :  { %1342 = vmatprep.subr.mxu1 %v2707_v28  ;;  %1413 = vmatprep.subr.mxu0 %v2709_v29  ;;  %v3860_v28 = vld [vmem:[#allocation18_spill] sm:$0xff]  ;;  %v3861_v29 = vld [vmem:[#allocation19_spill] sm:$0xff] }
 0x4a3   :  { %1343 = vmatpush1.msra.mxu1 %v2711_v30  ;;  %1414 = vmatpush1.msra.mxu0 %v2713_v31  ;;  %v3862_v30 = vld [vmem:[#allocation20_spill] sm:$0xff]  ;;  %v3863_v31 = vld [vmem:[#allocation21_spill] sm:$0xff] }
 0x4a4   :  { %1344 = vmatprep.subr.mxu1 %v2717_v32  ;;  %1415 = vmatprep.subr.mxu0 %v2719_v33  ;;  %v3864_v32 = vld [vmem:[#allocation22_spill] sm:$0xff]  ;;  %v3865_v33 = vld [vmem:[#allocation23_spill] sm:$0xff] }
 0x4a5   :  { %1345 = vmatpush1.msra.mxu1 %v2723_v34  ;;  %1416 = vmatpush1.msra.mxu0 %v2725_v35  ;;  %v3866_v34 = vld [vmem:[#allocation24_spill] sm:$0xff]  ;;  %v3867_v35 = vld [vmem:[#allocation25_spill] sm:$0xff] }
 0x4a6   :  { %1346 = vmatprep.subr.mxu1 %v2729_v36  ;;  %1417 = vmatprep.subr.mxu0 %v2731_v37  ;;  %v3868_v36 = vld [vmem:[#allocation26_spill] sm:$0xff]  ;;  %v3869_v37 = vld [vmem:[#allocation27_spill] sm:$0xff] }
 0x4a7   :  { %1347 = vmatpush1.msra.mxu1 %v2735_v38  ;;  %1418 = vmatpush1.msra.mxu0 %v2737_v39  ;;  %v3870_v38 = vld [vmem:[#allocation28_spill] sm:$0xff]  ;;  %v3871_v39 = vld [vmem:[#allocation29_spill] sm:$0xff] }
 0x4a8   :  { %1348 = vmatprep.subr.mxu1 %v2741_v40  ;;  %1419 = vmatprep.subr.mxu0 %v2743_v41  ;;  %v3872_v40 = vld [vmem:[#allocation30_spill] sm:$0xff]  ;;  %v3873_v41 = vld [vmem:[#allocation31_spill] sm:$0xff] }
 0x4a9   :  { %1349 = vmatpush1.msra.mxu1 %v2747_v42  ;;  %1420 = vmatpush1.msra.mxu0 %v2749_v43  ;;  %v3874_v42 = vld [vmem:[#allocation32_spill] sm:$0xff]  ;;  %v3875_v43 = vld [vmem:[#allocation33_spill] sm:$0xff] }
 0x4aa   :  { %1350 = vmatprep.subr.mxu1 %v2753_v44  ;;  %1421 = vmatprep.subr.mxu0 %v2755_v45  ;;  %v3876_v44 = vld [vmem:[#allocation34_spill] sm:$0xff]  ;;  %v3877_v45 = vld [vmem:[#allocation35_spill] sm:$0xff] }
 0x4ab   :  { %1351 = vmatpush1.msra.mxu1 %v2759_v46  ;;  %1422 = vmatpush1.msra.mxu0 %v2761_v47  ;;  %v3878_v46 = vmov 0.0   ;;  %v3879_v47 = vld [vmem:[#allocation36_spill] sm:$0xff] }
 0x4ac   :  { %1352 = vmatprep.subr.mxu1 %v2765_v48  ;;  %1423 = vmatprep.subr.mxu0 %v2767_v49  ;;  %v3207_v48 = vld [vmem:[#allocation5 + $0x1e8] sm:$0xff]  ;;  %v3210_v49 = vld [vmem:[#allocation5 + $0x1f8] sm:$0xff] }
 0x4ad   :  { %1353 = vmatpush1.msra.mxu1 %v2771_v50  ;;  %1424 = vmatpush1.msra.mxu0 %v2773_v51  ;;  %3880 = vst [vmem:[#allocation14_spill] sm:$0xff] %v3207_v48  ;;  %3881 = vst [vmem:[#allocation15_spill] sm:$0xff] %v3210_v49 }
 0x4ae   :  { %1354 = vmatprep.subr.mxu1 %v2777_v52  ;;  %1425 = vmatprep.subr.mxu0 %v2779_v53 }
 0x4af   :  { %1355 = vmatpush1.msra.mxu1 %v2783_v54  ;;  %1426 = vmatpush1.msra.mxu0 %v2785_v55 }
 0x4b0   :  { %1356 = vmatprep.subr.mxu1 %v2789_v56  ;;  %1427 = vmatprep.subr.mxu0 %v2791_v57 }
 0x4b1   :  { %1357 = vmatpush1.msra.mxu1 %v2795_v58  ;;  %1428 = vmatpush1.msra.mxu0 %v2797_v59  ;;  %v3882_v58 = vld [vmem:[#allocation37_spill] sm:$0xff] }
 0x4b2   :  { %1358 = vmatprep.subr.mxu1 %v2801_v60  ;;  %1429 = vmatprep.subr.mxu0 %v2803_v61 }
 0x4b3   :  { %1359 = vmatpush1.msra.mxu1 %v2807_v62  ;;  %1430 = vmatpush1.msra.mxu0 %v2809_v63 }
 0x4b4   :  { %1360 = vmatprep.subr.mxu1 %v2813_v1  ;;  %1431 = vmatprep.subr.mxu0 %v2815_v2 }
 0x4b5   :  { %1361 = vmatpush1.msra.mxu1 %v2819_v3  ;;  %1432 = vmatpush1.msra.mxu0 %v3858_v26  ;;  %v3230_v26 = vld [vmem:[#allocation5 + $0x1c8] sm:$0xff] }
 0x4b6   :  { %1362 = vmatprep.subr.mxu1 %v3859_v27  ;;  %1433 = vmatprep.subr.mxu0 %v3860_v28  ;;  %v3233_v27 = vld [vmem:[#allocation5 + $0x1d8] sm:$0xff]  ;;  %v3239_v28 = vld [vmem:[#allocation5 + $0x1d0] sm:$0xff] }
 0x4b7   :  { %1363 = vmatpush1.msra.mxu1 %v3861_v29  ;;  %1434 = vmatpush1.msra.mxu0 %v3862_v30  ;;  %v3242_v29 = vld [vmem:[#allocation5 + $0x1a8] sm:$0xff]  ;;  %v3245_v30 = vld [vmem:[#allocation5 + $0x1b8] sm:$0xff] }
 0x4b8   :  { %1364 = vmatprep.subr.mxu1 %v3863_v31  ;;  %1435 = vmatprep.subr.mxu0 %v3864_v32  ;;  %v3248_v31 = vld [vmem:[#allocation5 + $0x1a0] sm:$0xff]  ;;  %v3251_v32 = vld [vmem:[#allocation5 + $0x1b0] sm:$0xff] }
 0x4b9   :  { %1365 = vmatpush1.msra.mxu1 %v3865_v33  ;;  %1436 = vmatpush1.msra.mxu0 %v3866_v34  ;;  %v3254_v33 = vld [vmem:[#allocation5 + $0x188] sm:$0xff]  ;;  %v3257_v34 = vld [vmem:[#allocation5 + $0x198] sm:$0xff] }
 0x4ba   :  { %1366 = vmatprep.subr.mxu1 %v3867_v35  ;;  %1437 = vmatprep.subr.mxu0 %v3868_v36  ;;  %v3260_v35 = vld [vmem:[#allocation5 + $0x180] sm:$0xff]  ;;  %v3263_v36 = vld [vmem:[#allocation5 + $0x190] sm:$0xff] }
 0x4bb   :  { %1367 = vmatpush1.msra.mxu1 %v3869_v37  ;;  %1438 = vmatpush1.msra.mxu0 %v3870_v38  ;;  %v3266_v37 = vld [vmem:[#allocation5 + $0x168] sm:$0xff]  ;;  %v3269_v38 = vld [vmem:[#allocation5 + $0x178] sm:$0xff] }
 0x4bc   :  { %1368 = vmatprep.subr.mxu1 %v3871_v39  ;;  %1439 = vmatprep.subr.mxu0 %v3872_v40  ;;  %v3272_v39 = vld [vmem:[#allocation5 + $0x160] sm:$0xff]  ;;  %v3275_v40 = vld [vmem:[#allocation5 + $0x170] sm:$0xff] }
 0x4bd   :  { %1369 = vmatpush1.msra.mxu1 %v3873_v41  ;;  %1440 = vmatpush1.msra.mxu0 %v3874_v42  ;;  %v3278_v41 = vld [vmem:[#allocation5 + $0x148] sm:$0xff]  ;;  %v3281_v42 = vld [vmem:[#allocation5 + $0x158] sm:$0xff] }
 0x4be   :  { %1370 = vmatprep.subr.mxu1 %v3875_v43  ;;  %1441 = vmatprep.subr.mxu0 %v3876_v44  ;;  %v3284_v43 = vld [vmem:[#allocation5 + $0x140] sm:$0xff]  ;;  %v3287_v44 = vld [vmem:[#allocation5 + $0x150] sm:$0xff] }
 0x4bf   :  { %1371 = vmatpush1.msra.mxu1 %v3877_v45  ;;  %1404 = vmatprep.mubr.f32.mxu1 %v3878_v46  ;;  %v3290_v45 = vld [vmem:[#allocation5 + $0x128] sm:$0xff] }
 0x4c0   :  { %1442 = vmatpush1.msra.mxu0 %v3879_v47  ;;  %1475 = vmatprep.mubr.f32.mxu0 %v3878_v46  ;;  %v3293_v47 = vld [vmem:[#allocation5 + $0x138] sm:$0xff] }
 0x4c1   :  { %1522 = vmatprep.subr.mxu1 %v3207_v48  ;;  %1593 = vmatprep.subr.mxu0 %v3210_v49 }
 0x560   :  { %v1224_v50 = vpop.f32.mrf.mxu1  ;;  %v1295_v52 = vpop.f32.mrf.mxu0 }
 0x561   :  { %v1304_v51 = vrot.slane %v1224_v50, 5  ;;  %v1306_v57 = vrot.slane %v1295_v52, 5  ;;  %v3296_v50 = vld [vmem:[#allocation5 + $0x120] sm:$0xff]  ;;  %v3302_v52 = vld [vmem:[#allocation5 + $0x108] sm:$0xff] }
 0x562   :  { %v1226_v53 = vpop.f32.mrf.mxu1  ;;  %v1297_v61 = vpop.f32.mrf.mxu0 }
 0x563   :  { %v1312_v54 = vadd.f32 %v1304_v51, %v2965_v13  ;;  %v1305_v55 = vrot.slane %v1226_v53, 5  ;;  %v1314_v62 = vadd.f32 %v1306_v57, %v2971_v6  ;;  %v1307_v63 = vrot.slane %v1297_v61, 5  ;;  %v3299_v51 = vld [vmem:[#allocation5 + $0x130] sm:$0xff]  ;;  %v3305_v53 = vld [vmem:[#allocation5 + $0x118] sm:$0xff]  ;;  %v3326_v61 = vld [vmem:[#allocation5 + $0xc8] sm:$0xff] }
 0x564   :  { %v3317_v57 = vld [vmem:[#allocation5 + $0xf8] sm:$0xff] }
 0x565   :  { %v1316_v56 = vmul.f32 0.5, %v1312_v54  ;;  %v1313_v59 = vadd.f32 %v1305_v55, %v3882_v58  ;;  %v1315_v1 = vadd.f32 %v1307_v63, %v2974_v0  ;;  %v3308_v54 = vld [vmem:[#allocation5 + $0x100] sm:$0xff]  ;;  %v3311_v55 = vld [vmem:[#allocation5 + $0x110] sm:$0xff] }
 0x566   :  { %v3332_v63 = vld [vmem:[#allocation5 + $0xc0] sm:$0xff] }
 0x567   :  { %2341 = vtanh.f32 %v1316_v56  ;;  %v1320_v60 = vmul.f32 0.5, %v1313_v59  ;;  %v1325_v2 = vmul.f32 0.5, %v1315_v1  ;;  %v3314_v56 = vld [vmem:[#allocation5 + $0xe8] sm:$0xff]  ;;  %v3320_v59 = vld [vmem:[#allocation5 + $0xe0] sm:$0xff]  ;;  %v3335_v1 = vld [vmem:[#allocation5 + $0xd0] sm:$0xff] }
 0x569   :  { %2343 = vtanh.f32 %v1320_v60  ;;  %v3323_v60 = vld [vmem:[#allocation5 + $0xf0] sm:$0xff] }
 0x56a   :  { %2345 = vtanh.f32 %v1314_v62  ;;  %v3329_v62 = vld [vmem:[#allocation5 + $0xd8] sm:$0xff] }
 0x56b   :  { %2347 = vtanh.f32 %v1325_v2  ;;  %v3338_v2 = vld [vmem:[#allocation5 + $0xa8] sm:$0xff] }
 0x574   :  { %v2342_v3 = vpop.eup %2341 }
 0x575   :  { %v1318_v11 = vmul.f32 0.5, %v2342_v3  ;;  %v3341_v3 = vld [vmem:[#allocation5 + $0xb8] sm:$0xff] }
 0x576   :  { %v2344_v9 = vpop.eup %2343 }
 0x577   :  { %v1319_v16 = vadd.f32 0.5, %v1318_v11  ;;  %v1322_v18 = vmul.f32 0.5, %v2344_v9  ;;  %v2346_v14 = vpop.eup %2345  ;;  %v3344_v11 = vld [vmem:[#allocation5 + $0xa0] sm:$0xff]  ;;  %v3347_v9 = vld [vmem:[#allocation5 + $0xb0] sm:$0xff] }
 0x578   :  { %v2348_v15 = vpop.eup %2347  ;;  %3883 = vst [vmem:[#allocation38_spill] sm:$0xff] %v3347_v9 }
 0x579   :  { %v1323_v8 = vadd.f32 0.5, %v1322_v18  ;;  %v1333_v10 = vmul.f32 %v2346_v14, %v1319_v16  ;;  %v1327_v5 = vmul.f32 0.5, %v2348_v15  ;;  %v3350_v16 = vld [vmem:[#allocation5 + $0x88] sm:$0xff]  ;;  %v3353_v18 = vld [vmem:[#allocation5 + $0x98] sm:$0xff]  ;;  %v3371_v15 = vld [vmem:[#allocation5 + $0x70] sm:$0xff] }
 0x57a   :  { %3884 = vst [vmem:[#allocation16_spill] sm:$0xff] %v3350_v16  ;;  %3885 = vst [vmem:[#allocation17_spill] sm:$0xff] %v3353_v18  ;;  %v3362_v14 = vld [vmem:[#allocation5 + $0x68] sm:$0xff] }
 0x57b   :  { %v1332_v23 = vmul.f32 %v1330_v21, %v1323_v8  ;;  %v1328_v20 = vadd.f32 0.5, %v1327_v5  ;;  %v3356_v8 = vld [vmem:[#allocation5 + $0x80] sm:$0xff]  ;;  %v3359_v21 = vld [vmem:[#allocation5 + $0x90] sm:$0xff]  ;;  %3888 = vst [vmem:[#allocation20_spill] sm:$0xff] %v3362_v14  ;;  %3891 = vst [vmem:[#allocation23_spill] sm:$0xff] %v3371_v15 }
 0x57c   :  { %3886 = vst [vmem:[#allocation18_spill] sm:$0xff] %v3356_v8  ;;  %3887 = vst [vmem:[#allocation19_spill] sm:$0xff] %v3359_v21  ;;  %v3374_v5 = vld [vmem:[#allocation5 + $0x48] sm:$0xff] }
 0x57d   :  { %v3218_v25 = vadd.f32 %v1333_v10, %v1332_v23  ;;  %v3365_v23 = vld [vmem:[#allocation5 + $0x78] sm:$0xff]  ;;  %v3368_v10 = vld [vmem:[#allocation5 + $0x60] sm:$0xff]  ;;  %3892 = vst [vmem:[#allocation24_spill] sm:$0xff] %v3374_v5 }
 0x57e   :  { %3889 = vst [vmem:[#allocation21_spill] sm:$0xff] %v3365_v23  ;;  %3890 = vst [vmem:[#allocation22_spill] sm:$0xff] %v3368_v10 }
 0x57f   :  { %2349 = vtanh.f32 %v3218_v25 }
 0x58c   :  { %v2350_v22 = vpop.eup %2349 }
 0x58d   :  { %v1336_v12 = vmul.f32 %v2350_v22, %v1328_v20  ;;  %v3377_v20 = vld [vmem:[#allocation5 + $0x58] sm:$0xff]  ;;  %v3380_v22 = vld [vmem:[#allocation5 + $0x40] sm:$0xff] }
 0x58e   :  { %3893 = vst [vmem:[#allocation25_spill] sm:$0xff] %v3377_v20  ;;  %3894 = vst [vmem:[#allocation26_spill] sm:$0xff] %v3380_v22 }
 0x58f   :  { %v1338_v19 = vrot.slane %v1336_v12, 3  ;;  %v3222_v4 = vsel %vm2070_vm7, %v3141_v17, %v1336_v12  ;;  %v3236_v17 = vld [vmem:[#allocation5 + $0x1c0] sm:$0xff]  ;;  %v3383_v12 = vld [vmem:[#allocation5 + $0x50] sm:$0xff] }
 0x590   :  { %3895 = vst [vmem:[#allocation27_spill] sm:$0xff] %v3383_v12 }
 0x591   :  { %1405 = vmatmul.mubr.f32.vlgmr.msra.gmra.mxu1 %v1338_v19  ;;  %1476 = vmatmul.mubr.f32.vlgmr.msra.gmra.mxu0 %v1338_v19  ;;  %v3386_v19 = vld [vmem:[#allocation5 + $0x28] sm:$0xff] }
 0x592   :  { %1523 = vmatpush1.msra.mxu1 %v3224_v7  ;;  %1594 = vmatpush1.msra.mxu0 %v3227_v24  ;;  %3896 = vst [vmem:[#allocation28_spill] sm:$0xff] %v3386_v19 }
 0x593   :  { %1524 = vmatprep.subr.mxu1 %v3230_v26  ;;  %1595 = vmatprep.subr.mxu0 %v3233_v27 }
 0x594   :  { %1525 = vmatpush1.msra.mxu1 %v3236_v17  ;;  %1596 = vmatpush1.msra.mxu0 %v3239_v28 }
 0x595   :  { %1526 = vmatprep.subr.mxu1 %v3242_v29  ;;  %1597 = vmatprep.subr.mxu0 %v3245_v30 }
 0x596   :  { %1527 = vmatpush1.msra.mxu1 %v3248_v31  ;;  %1598 = vmatpush1.msra.mxu0 %v3251_v32 }
 0x597   :  { %1528 = vmatprep.subr.mxu1 %v3254_v33  ;;  %1599 = vmatprep.subr.mxu0 %v3257_v34 }
 0x598   :  { %1529 = vmatpush1.msra.mxu1 %v3260_v35  ;;  %1600 = vmatpush1.msra.mxu0 %v3263_v36 }
 0x599   :  { %1530 = vmatprep.subr.mxu1 %v3266_v37  ;;  %1601 = vmatprep.subr.mxu0 %v3269_v38 }
 0x59a   :  { %1531 = vmatpush1.msra.mxu1 %v3272_v39  ;;  %1602 = vmatpush1.msra.mxu0 %v3275_v40 }
 0x59b   :  { %1532 = vmatprep.subr.mxu1 %v3278_v41  ;;  %1603 = vmatprep.subr.mxu0 %v3281_v42 }
 0x59c   :  { %1533 = vmatpush1.msra.mxu1 %v3284_v43  ;;  %1604 = vmatpush1.msra.mxu0 %v3287_v44 }
 0x59d   :  { %1534 = vmatprep.subr.mxu1 %v3290_v45  ;;  %1605 = vmatprep.subr.mxu0 %v3293_v47 }
 0x59e   :  { %1535 = vmatpush1.msra.mxu1 %v3296_v50  ;;  %1606 = vmatpush1.msra.mxu0 %v3299_v51 }
 0x59f   :  { %1536 = vmatprep.subr.mxu1 %v3302_v52  ;;  %1607 = vmatprep.subr.mxu0 %v3305_v53 }
 0x5a0   :  { %1537 = vmatpush1.msra.mxu1 %v3308_v54  ;;  %1608 = vmatpush1.msra.mxu0 %v3311_v55 }
 0x5a1   :  { %1538 = vmatprep.subr.mxu1 %v3314_v56  ;;  %1609 = vmatprep.subr.mxu0 %v3317_v57 }
 0x5a2   :  { %1539 = vmatpush1.msra.mxu1 %v3320_v59  ;;  %1610 = vmatpush1.msra.mxu0 %v3323_v60 }
 0x5a3   :  { %1540 = vmatprep.subr.mxu1 %v3326_v61  ;;  %1611 = vmatprep.subr.mxu0 %v3329_v62 }
 0x5a4   :  { %1541 = vmatpush1.msra.mxu1 %v3332_v63  ;;  %1612 = vmatpush1.msra.mxu0 %v3335_v1 }
 0x5a5   :  { %1542 = vmatprep.subr.mxu1 %v3338_v2  ;;  %1613 = vmatprep.subr.mxu0 %v3341_v3 }
 0x5a6   :  { %1543 = vmatpush1.msra.mxu1 %v3344_v11  ;;  %1614 = vmatpush1.msra.mxu0 %v3347_v9 }
 0x5a7   :  { %1544 = vmatprep.subr.mxu1 %v3350_v16  ;;  %1615 = vmatprep.subr.mxu0 %v3353_v18 }
 0x5a8   :  { %1545 = vmatpush1.msra.mxu1 %v3356_v8  ;;  %1616 = vmatpush1.msra.mxu0 %v3359_v21 }
 0x5a9   :  { %1546 = vmatprep.subr.mxu1 %v3362_v14  ;;  %1617 = vmatprep.subr.mxu0 %v3365_v23 }
 0x5aa   :  { %1547 = vmatpush1.msra.mxu1 %v3368_v10  ;;  %1618 = vmatpush1.msra.mxu0 %v3371_v15  ;;  %v3389_v15 = vld [vmem:[#allocation5 + $0x38] sm:$0xff] }
 0x5ab   :  { %1548 = vmatprep.subr.mxu1 %v3374_v5  ;;  %1619 = vmatprep.subr.mxu0 %v3377_v20  ;;  %3897 = vst [vmem:[#allocation29_spill] sm:$0xff] %v3389_v15  ;;  %v3392_v5 = vld [vmem:[#allocation5 + $0x20] sm:$0xff]  ;;  %v3395_v20 = vld [vmem:[#allocation5 + $0x30] sm:$0xff] }
 0x5ac   :  { %1549 = vmatpush1.msra.mxu1 %v3380_v22  ;;  %1620 = vmatpush1.msra.mxu0 %v3383_v12  ;;  %3898 = vst [vmem:[#allocation30_spill] sm:$0xff] %v3392_v5  ;;  %3899 = vst [vmem:[#allocation31_spill] sm:$0xff] %v3395_v20  ;;  %v3398_v22 = vld [vmem:[#allocation5 + $0x8] sm:$0xff]  ;;  %v3401_v12 = vld [vmem:[#allocation5 + $0x18] sm:$0xff] }
 0x5ad   :  { %1550 = vmatprep.subr.mxu1 %v3386_v19  ;;  %1621 = vmatprep.subr.mxu0 %v3389_v15  ;;  %3900 = vst [vmem:[#allocation32_spill] sm:$0xff] %v3398_v22  ;;  %3901 = vst [vmem:[#allocation33_spill] sm:$0xff] %v3401_v12  ;;  %v3404_v19 = vld [vmem:[#allocation5] sm:$0xff]  ;;  %v3408_v15 = vld [vmem:[#allocation5 + $0x10] sm:$0xff] }
 0x5ae   :  { %1551 = vmatpush1.msra.mxu1 %v3392_v5  ;;  %1622 = vmatpush1.msra.mxu0 %v3395_v20  ;;  %3902 = vst [vmem:[#allocation34_spill] sm:$0xff] %v3404_v19  ;;  %3903 = vst [vmem:[#allocation35_spill] sm:$0xff] %v3408_v15 }
 0x5af   :  { %1552 = vmatprep.subr.mxu1 %v3398_v22  ;;  %1623 = vmatprep.subr.mxu0 %v3401_v12 }
 0x5b0   :  { %1553 = vmatpush1.msra.mxu1 %v3404_v19  ;;  %1586 = vmatprep.mubr.f32.mxu1 %v3878_v46 }
 0x5b1   :  { %1624 = vmatpush1.msra.mxu0 %v3408_v15  ;;  %1657 = vmatprep.mubr.f32.mxu0 %v3878_v46 }
 0x5b2   :  { %1704 = vmatprep.subr.mxu1 %v3207_v48  ;;  %1775 = vmatprep.subr.mxu0 %v3210_v49 }
 0x651   :  { %v1406_v22 = vpop.f32.mrf.mxu1  ;;  %v1477_v5 = vpop.f32.mrf.mxu0 }
 0x652   :  { %v1486_v20 = vrot.slane %v1406_v22, 4  ;;  %v1488_v14 = vrot.slane %v1477_v5, 4 }
 0x653   :  { %v1408_v12 = vpop.f32.mrf.mxu1  ;;  %v1479_v15 = vpop.f32.mrf.mxu0 }
 0x654   :  { %v1494_v10 = vadd.f32 %v1486_v20, %v2965_v13  ;;  %v1487_v23 = vrot.slane %v1408_v12, 4  ;;  %v1496_v46 = vadd.f32 %v1488_v14, %v2971_v6  ;;  %v1489_v48 = vrot.slane %v1479_v15, 4  ;;  %v3907_v15 = vld [vmem:[#allocation18_spill] sm:$0xff] }
 0x656   :  { %v1498_v19 = vmul.f32 0.5, %v1494_v10  ;;  %v1495_v21 = vadd.f32 %v1487_v23, %v3882_v58  ;;  %v1497_v49 = vadd.f32 %v1489_v48, %v2974_v0  ;;  %v1512_v23 = vrot.slane %v3218_v25, 7  ;;  %v3904_v25 = vld [vmem:[#allocation38_spill] sm:$0xff] }
 0x658   :  { %2351 = vtanh.f32 %v1498_v19  ;;  %v1502_v8 = vmul.f32 0.5, %v1495_v21  ;;  %v1507_v22 = vmul.f32 0.5, %v1497_v49 }
 0x65a   :  { %2353 = vtanh.f32 %v1502_v8 }
 0x65b   :  { %2355 = vtanh.f32 %v1496_v46 }
 0x65c   :  { %2357 = vtanh.f32 %v1507_v22  ;;  %v3908_v22 = vld [vmem:[#allocation19_spill] sm:$0xff] }
 0x665   :  { %v2352_v18 = vpop.eup %2351 }
 0x666   :  { %v1500_v16 = vmul.f32 0.5, %v2352_v18 }
 0x667   :  { %v2354_v9 = vpop.eup %2353 }
 0x668   :  { %v1501_v20 = vadd.f32 0.5, %v1500_v16  ;;  %v1504_v12 = vmul.f32 0.5, %v2354_v9  ;;  %v2356_v5 = vpop.eup %2355  ;;  %v3906_v16 = vld [vmem:[#allocation17_spill] sm:$0xff] }
 0x669   :  { %v2358_v46 = vpop.eup %2357 }
 0x66a   :  { %v1505_v10 = vadd.f32 0.5, %v1504_v12  ;;  %v1515_v19 = vmul.f32 %v2356_v5, %v1501_v20  ;;  %v1509_v8 = vmul.f32 0.5, %v2358_v46  ;;  %v3909_v20 = vld [vmem:[#allocation20_spill] sm:$0xff]  ;;  %v3910_v12 = vld [vmem:[#allocation21_spill] sm:$0xff]  ;;  %v3916_v46 = vld [vmem:[#allocation27_spill] sm:$0xff] }
 0x66b   :  { %v3913_v5 = vld [vmem:[#allocation24_spill] sm:$0xff] }
 0x66c   :  { %v1514_v21 = vmul.f32 %v1512_v23, %v1505_v10  ;;  %v1510_v48 = vadd.f32 0.5, %v1509_v8  ;;  %v3911_v10 = vld [vmem:[#allocation22_spill] sm:$0xff]  ;;  %v3912_v23 = vld [vmem:[#allocation23_spill] sm:$0xff]  ;;  %v3917_v8 = vld [vmem:[#allocation28_spill] sm:$0xff] }
 0x66e   :  { %v3419_v58 = vadd.f32 %v1515_v19, %v1514_v21  ;;  %v3914_v21 = vld [vmem:[#allocation25_spill] sm:$0xff]  ;;  %v3915_v19 = vld [vmem:[#allocation26_spill] sm:$0xff] }
 0x670   :  { %2359 = vtanh.f32 %v3419_v58 }
 0x67d   :  { %v2360_v49 = vpop.eup %2359 }
 0x67e   :  { %v1518_v18 = vmul.f32 %v2360_v49, %v1510_v48  ;;  %v3918_v48 = vld [vmem:[#allocation29_spill] sm:$0xff]  ;;  %v3919_v49 = vld [vmem:[#allocation30_spill] sm:$0xff] }
 0x680   :  { %v1520_v14 = vrot.slane %v1518_v18, 4  ;;  %v3423_v9 = vsel %vm2072_vm8, %v3222_v4, %v1518_v18  ;;  %v3905_v4 = vld [vmem:[#allocation16_spill] sm:$0xff]  ;;  %v3920_v18 = vld [vmem:[#allocation31_spill] sm:$0xff] }
 0x682   :  { %1587 = vmatmul.mubr.f32.vlgmr.msra.gmra.mxu1 %v1520_v14  ;;  %1658 = vmatmul.mubr.f32.vlgmr.msra.gmra.mxu0 %v1520_v14  ;;  %v3921_v14 = vld [vmem:[#allocation32_spill] sm:$0xff] }
 0x683   :  { %1705 = vmatpush1.msra.mxu1 %v3224_v7  ;;  %1776 = vmatpush1.msra.mxu0 %v3227_v24 }
 0x684   :  { %1706 = vmatprep.subr.mxu1 %v3230_v26  ;;  %1777 = vmatprep.subr.mxu0 %v3233_v27 }
 0x685   :  { %1707 = vmatpush1.msra.mxu1 %v3236_v17  ;;  %1778 = vmatpush1.msra.mxu0 %v3239_v28 }
 0x686   :  { %1708 = vmatprep.subr.mxu1 %v3242_v29  ;;  %1779 = vmatprep.subr.mxu0 %v3245_v30 }
 0x687   :  { %1709 = vmatpush1.msra.mxu1 %v3248_v31  ;;  %1780 = vmatpush1.msra.mxu0 %v3251_v32 }
 0x688   :  { %1710 = vmatprep.subr.mxu1 %v3254_v33  ;;  %1781 = vmatprep.subr.mxu0 %v3257_v34 }
 0x689   :  { %1711 = vmatpush1.msra.mxu1 %v3260_v35  ;;  %1782 = vmatpush1.msra.mxu0 %v3263_v36 }
 0x68a   :  { %1712 = vmatprep.subr.mxu1 %v3266_v37  ;;  %1783 = vmatprep.subr.mxu0 %v3269_v38 }
 0x68b   :  { %1713 = vmatpush1.msra.mxu1 %v3272_v39  ;;  %1784 = vmatpush1.msra.mxu0 %v3275_v40 }
 0x68c   :  { %1714 = vmatprep.subr.mxu1 %v3278_v41  ;;  %1785 = vmatprep.subr.mxu0 %v3281_v42 }
 0x68d   :  { %1715 = vmatpush1.msra.mxu1 %v3284_v43  ;;  %1786 = vmatpush1.msra.mxu0 %v3287_v44 }
 0x68e   :  { %1716 = vmatprep.subr.mxu1 %v3290_v45  ;;  %1787 = vmatprep.subr.mxu0 %v3293_v47 }
 0x68f   :  { %1717 = vmatpush1.msra.mxu1 %v3296_v50  ;;  %1788 = vmatpush1.msra.mxu0 %v3299_v51 }
 0x690   :  { %1718 = vmatprep.subr.mxu1 %v3302_v52  ;;  %1789 = vmatprep.subr.mxu0 %v3305_v53 }
 0x691   :  { %1719 = vmatpush1.msra.mxu1 %v3308_v54  ;;  %1790 = vmatpush1.msra.mxu0 %v3311_v55 }
 0x692   :  { %1720 = vmatprep.subr.mxu1 %v3314_v56  ;;  %1791 = vmatprep.subr.mxu0 %v3317_v57 }
 0x693   :  { %1721 = vmatpush1.msra.mxu1 %v3320_v59  ;;  %1792 = vmatpush1.msra.mxu0 %v3323_v60 }
 0x694   :  { %1722 = vmatprep.subr.mxu1 %v3326_v61  ;;  %1793 = vmatprep.subr.mxu0 %v3329_v62 }
 0x695   :  { %1723 = vmatpush1.msra.mxu1 %v3332_v63  ;;  %1794 = vmatpush1.msra.mxu0 %v3335_v1 }
 0x696   :  { %1724 = vmatprep.subr.mxu1 %v3338_v2  ;;  %1795 = vmatprep.subr.mxu0 %v3341_v3 }
 0x697   :  { %1725 = vmatpush1.msra.mxu1 %v3344_v11  ;;  %1796 = vmatpush1.msra.mxu0 %v3904_v25 }
 0x698   :  { %1726 = vmatprep.subr.mxu1 %v3905_v4  ;;  %1797 = vmatprep.subr.mxu0 %v3906_v16 }
 0x699   :  { %1727 = vmatpush1.msra.mxu1 %v3907_v15  ;;  %1798 = vmatpush1.msra.mxu0 %v3908_v22 }
 0x69a   :  { %1728 = vmatprep.subr.mxu1 %v3909_v20  ;;  %1799 = vmatprep.subr.mxu0 %v3910_v12 }
 0x69b   :  { %1729 = vmatpush1.msra.mxu1 %v3911_v10  ;;  %1800 = vmatpush1.msra.mxu0 %v3912_v23  ;;  %v3922_v10 = vld [vmem:[#allocation33_spill] sm:$0xff]  ;;  %v3923_v23 = vld [vmem:[#allocation34_spill] sm:$0xff] }
 0x69c   :  { %1730 = vmatprep.subr.mxu1 %v3913_v5  ;;  %1801 = vmatprep.subr.mxu0 %v3914_v21  ;;  %v3924_v5 = vmov 0.0   ;;  %v3925_v21 = vld [vmem:[#allocation35_spill] sm:$0xff] }
 0x69d   :  { %1731 = vmatpush1.msra.mxu1 %v3915_v19  ;;  %1802 = vmatpush1.msra.mxu0 %v3916_v46  ;;  %v3926_v46 = vld [vmem:[#allocation14_spill] sm:$0xff] }
 0x69e   :  { %1732 = vmatprep.subr.mxu1 %v3917_v8  ;;  %1803 = vmatprep.subr.mxu0 %v3918_v48  ;;  %v3927_v8 = vld [vmem:[#allocation15_spill] sm:$0xff] }
 0x69f   :  { %1733 = vmatpush1.msra.mxu1 %v3919_v49  ;;  %1804 = vmatpush1.msra.mxu0 %v3920_v18 }
 0x6a0   :  { %1734 = vmatprep.subr.mxu1 %v3921_v14  ;;  %1805 = vmatprep.subr.mxu0 %v3922_v10 }
 0x6a1   :  { %1735 = vmatpush1.msra.mxu1 %v3923_v23  ;;  %1768 = vmatprep.mubr.f32.mxu1 %v3924_v5  ;;  %v3928_v23 = vld [vmem:[#allocation37_spill] sm:$0xff] }
 0x6a2   :  { %1806 = vmatpush1.msra.mxu0 %v3925_v21  ;;  %1839 = vmatprep.mubr.f32.mxu0 %v3924_v5 }
 0x6a3   :  { %1886 = vmatprep.subr.mxu1 %v3926_v46  ;;  %1957 = vmatprep.subr.mxu0 %v3927_v8 }
 0x742   :  { %v1588_v48 = vpop.f32.mrf.mxu1  ;;  %v1659_v19 = vpop.f32.mrf.mxu0 }
 0x743   :  { %v1668_v49 = vrot.slane %v1588_v48, 3  ;;  %v1670_v20 = vrot.slane %v1659_v19, 3 }
 0x744   :  { %v1590_v18 = vpop.f32.mrf.mxu1  ;;  %v1661_v21 = vpop.f32.mrf.mxu0 }
 0x745   :  { %v1676_v14 = vadd.f32 %v1668_v49, %v2965_v13  ;;  %v1669_v12 = vrot.slane %v1590_v18, 3  ;;  %v1678_v5 = vadd.f32 %v1670_v20, %v2971_v6  ;;  %v1671_v46 = vrot.slane %v1661_v21, 3 }
 0x747   :  { %v1680_v10 = vmul.f32 0.5, %v1676_v14  ;;  %v1677_v22 = vadd.f32 %v1669_v12, %v3928_v23  ;;  %v1679_v8 = vadd.f32 %v1671_v46, %v2974_v0  ;;  %v1694_v12 = vrot.slane %v3419_v58, 7  ;;  %v3929_v58 = vld [vmem:[#allocation38_spill] sm:$0xff] }
 0x749   :  { %2361 = vtanh.f32 %v1680_v10  ;;  %v1684_v15 = vmul.f32 0.5, %v1677_v22  ;;  %v1689_v48 = vmul.f32 0.5, %v1679_v8 }
 0x74b   :  { %2363 = vtanh.f32 %v1684_v15 }
 0x74c   :  { %2365 = vtanh.f32 %v1678_v5 }
 0x74d   :  { %2367 = vtanh.f32 %v1689_v48 }
 0x756   :  { %v2362_v16 = vpop.eup %2361 }
 0x757   :  { %v1682_v4 = vmul.f32 0.5, %v2362_v16 }
 0x758   :  { %v2364_v25 = vpop.eup %2363 }
 0x759   :  { %v1683_v49 = vadd.f32 0.5, %v1682_v4  ;;  %v1686_v18 = vmul.f32 0.5, %v2364_v25  ;;  %v2366_v10 = vpop.eup %2365 }
 0x75a   :  { %v2368_v15 = vpop.eup %2367 }
 0x75b   :  { %v1687_v19 = vadd.f32 0.5, %v1686_v18  ;;  %v1697_v14 = vmul.f32 %v2366_v10, %v1683_v49  ;;  %v1691_v20 = vmul.f32 0.5, %v2368_v15 }
 0x75d   :  { %v1696_v22 = vmul.f32 %v1694_v12, %v1687_v19  ;;  %v1692_v5 = vadd.f32 0.5, %v1691_v20 }
 0x75f   :  { %v3496_v23 = vadd.f32 %v1697_v14, %v1696_v22 }
 0x761   :  { %2369 = vtanh.f32 %v3496_v23  ;;  %v1876_v8 = vrot.slane %v3496_v23, 7  ;;  %v2094_v23 = vld [vmem:[%s3674_s12 + $0x78] sm:$0xff] }
 0x76e   :  { %v2370_v21 = vpop.eup %2369 }
 0x76f   :  { %v1700_v16 = vmul.f32 %v2370_v21, %v1692_v5  ;;  %v2093_v21 = vld [vmem:[%s3674_s12 + $0x70] sm:$0xff] }
 0x771   :  { %v1702_v46 = vrot.slane %v1700_v16, 5  ;;  %v3500_v25 = vsel %vm2074_vm9, %v3423_v9, %v1700_v16  ;;  %v2092_v16 = vld [vmem:[%s3674_s12 + $0x68] sm:$0xff] }
 0x773   :  { %1769 = vmatmul.mubr.f32.vlgmr.msra.gmra.mxu1 %v1702_v46  ;;  %1840 = vmatmul.mubr.f32.vlgmr.msra.gmra.mxu0 %v1702_v46  ;;  %v2091_v46 = vld [vmem:[%s3674_s12 + $0x60] sm:$0xff] }
 0x774   :  { %1887 = vmatpush1.msra.mxu1 %v3224_v7  ;;  %1958 = vmatpush1.msra.mxu0 %v3227_v24  ;;  %v3930_v7 = vld [vmem:[#allocation16_spill] sm:$0xff]  ;;  %v3931_v24 = vld [vmem:[#allocation17_spill] sm:$0xff] }
 0x775   :  { %1888 = vmatprep.subr.mxu1 %v3230_v26  ;;  %1959 = vmatprep.subr.mxu0 %v3233_v27  ;;  %v3932_v26 = vld [vmem:[#allocation18_spill] sm:$0xff]  ;;  %v3933_v27 = vld [vmem:[#allocation19_spill] sm:$0xff] }
 0x776   :  { %1889 = vmatpush1.msra.mxu1 %v3236_v17  ;;  %1960 = vmatpush1.msra.mxu0 %v3239_v28  ;;  %v3934_v17 = vld [vmem:[#allocation20_spill] sm:$0xff]  ;;  %v3935_v28 = vld [vmem:[#allocation21_spill] sm:$0xff] }
 0x777   :  { %1890 = vmatprep.subr.mxu1 %v3242_v29  ;;  %1961 = vmatprep.subr.mxu0 %v3245_v30  ;;  %v3936_v29 = vld [vmem:[#allocation22_spill] sm:$0xff]  ;;  %v3937_v30 = vld [vmem:[#allocation23_spill] sm:$0xff] }
 0x778   :  { %1891 = vmatpush1.msra.mxu1 %v3248_v31  ;;  %1962 = vmatpush1.msra.mxu0 %v3251_v32  ;;  %v3938_v31 = vld [vmem:[#allocation24_spill] sm:$0xff]  ;;  %v3939_v32 = vld [vmem:[#allocation25_spill] sm:$0xff] }
 0x779   :  { %1892 = vmatprep.subr.mxu1 %v3254_v33  ;;  %1963 = vmatprep.subr.mxu0 %v3257_v34  ;;  %v3940_v33 = vld [vmem:[#allocation26_spill] sm:$0xff]  ;;  %v3941_v34 = vld [vmem:[#allocation27_spill] sm:$0xff] }
 0x77a   :  { %1893 = vmatpush1.msra.mxu1 %v3260_v35  ;;  %1964 = vmatpush1.msra.mxu0 %v3263_v36  ;;  %v3942_v35 = vld [vmem:[#allocation28_spill] sm:$0xff]  ;;  %v3943_v36 = vld [vmem:[#allocation29_spill] sm:$0xff] }
 0x77b   :  { %1894 = vmatprep.subr.mxu1 %v3266_v37  ;;  %1965 = vmatprep.subr.mxu0 %v3269_v38  ;;  %v3944_v37 = vld [vmem:[#allocation30_spill] sm:$0xff]  ;;  %v3945_v38 = vld [vmem:[#allocation31_spill] sm:$0xff] }
 0x77c   :  { %1895 = vmatpush1.msra.mxu1 %v3272_v39  ;;  %1966 = vmatpush1.msra.mxu0 %v3275_v40  ;;  %v3946_v39 = vld [vmem:[#allocation32_spill] sm:$0xff]  ;;  %v3947_v40 = vld [vmem:[#allocation33_spill] sm:$0xff] }
 0x77d   :  { %1896 = vmatprep.subr.mxu1 %v3278_v41  ;;  %1967 = vmatprep.subr.mxu0 %v3281_v42  ;;  %v3948_v41 = vld [vmem:[#allocation34_spill] sm:$0xff]  ;;  %v3949_v42 = vmov 0.0  }
 0x77e   :  { %1897 = vmatpush1.msra.mxu1 %v3284_v43  ;;  %1968 = vmatpush1.msra.mxu0 %v3287_v44  ;;  %v3950_v43 = vld [vmem:[#allocation35_spill] sm:$0xff] }
 0x77f   :  { %1898 = vmatprep.subr.mxu1 %v3290_v45  ;;  %1969 = vmatprep.subr.mxu0 %v3293_v47 }
 0x780   :  { %1899 = vmatpush1.msra.mxu1 %v3296_v50  ;;  %1970 = vmatpush1.msra.mxu0 %v3299_v51 }
 0x781   :  { %1900 = vmatprep.subr.mxu1 %v3302_v52  ;;  %1971 = vmatprep.subr.mxu0 %v3305_v53 }
 0x782   :  { %1901 = vmatpush1.msra.mxu1 %v3308_v54  ;;  %1972 = vmatpush1.msra.mxu0 %v3311_v55  ;;  %v3951_v55 = vld [vmem:[#allocation37_spill] sm:$0xff] }
 0x783   :  { %1902 = vmatprep.subr.mxu1 %v3314_v56  ;;  %1973 = vmatprep.subr.mxu0 %v3317_v57 }
 0x784   :  { %1903 = vmatpush1.msra.mxu1 %v3320_v59  ;;  %1974 = vmatpush1.msra.mxu0 %v3323_v60 }
 0x785   :  { %1904 = vmatprep.subr.mxu1 %v3326_v61  ;;  %1975 = vmatprep.subr.mxu0 %v3329_v62 }
 0x786   :  { %1905 = vmatpush1.msra.mxu1 %v3332_v63  ;;  %1976 = vmatpush1.msra.mxu0 %v3335_v1 }
 0x787   :  { %1906 = vmatprep.subr.mxu1 %v3338_v2  ;;  %1977 = vmatprep.subr.mxu0 %v3341_v3 }
 0x788   :  { %1907 = vmatpush1.msra.mxu1 %v3344_v11  ;;  %1978 = vmatpush1.msra.mxu0 %v3929_v58  ;;  %v2089_v58 = vld [vmem:[%s3674_s12 + $0x50] sm:$0xff] }
 0x789   :  { %1908 = vmatprep.subr.mxu1 %v3930_v7  ;;  %1979 = vmatprep.subr.mxu0 %v3931_v24  ;;  %v2088_v7 = vld [vmem:[%s3674_s12 + $0x48] sm:$0xff]  ;;  %v2087_v24 = vld [vmem:[%s3674_s12 + $0x40] sm:$0xff] }
 0x78a   :  { %1909 = vmatpush1.msra.mxu1 %v3932_v26  ;;  %1980 = vmatpush1.msra.mxu0 %v3933_v27  ;;  %v2086_v26 = vld [vmem:[%s3674_s12 + $0x38] sm:$0xff]  ;;  %v2085_v27 = vld [vmem:[%s3674_s12 + $0x30] sm:$0xff] }
 0x78b   :  { %1910 = vmatprep.subr.mxu1 %v3934_v17  ;;  %1981 = vmatprep.subr.mxu0 %v3935_v28  ;;  %v2084_v17 = vld [vmem:[%s3674_s12 + $0x28] sm:$0xff]  ;;  %v2083_v28 = vld [vmem:[%s3674_s12 + $0x20] sm:$0xff] }
 0x78c   :  { %1911 = vmatpush1.msra.mxu1 %v3936_v29  ;;  %1982 = vmatpush1.msra.mxu0 %v3937_v30  ;;  %v2082_v29 = vld [vmem:[%s3674_s12 + $0x18] sm:$0xff]  ;;  %v2081_v30 = vld [vmem:[%s3674_s12 + $0x10] sm:$0xff] }
 0x78d   :  { %1912 = vmatprep.subr.mxu1 %v3938_v31  ;;  %1983 = vmatprep.subr.mxu0 %v3939_v32  ;;  %v2080_v31 = vld [vmem:[%s3674_s12 + $0x8] sm:$0xff]  ;;  %v2079_v32 = vld [vmem:[%s3674_s12] sm:$0xff] }
 0x78e   :  { %1913 = vmatpush1.msra.mxu1 %v3940_v33  ;;  %1984 = vmatpush1.msra.mxu0 %v3941_v34 }
 0x78f   :  { %1914 = vmatprep.subr.mxu1 %v3942_v35  ;;  %1985 = vmatprep.subr.mxu0 %v3943_v36 }
 0x790   :  { %1915 = vmatpush1.msra.mxu1 %v3944_v37  ;;  %1986 = vmatpush1.msra.mxu0 %v3945_v38 }
 0x791   :  { %1916 = vmatprep.subr.mxu1 %v3946_v39  ;;  %1987 = vmatprep.subr.mxu0 %v3947_v40 }
 0x792   :  { %1917 = vmatpush1.msra.mxu1 %v3948_v41  ;;  %1950 = vmatprep.mubr.f32.mxu1 %v3949_v42 }
 0x793   :  { %1988 = vmatpush1.msra.mxu0 %v3950_v43  ;;  %2021 = vmatprep.mubr.f32.mxu0 %v3949_v42 }
 0x794   :  { %2268 = vmatprep.subr.mxu1 %v3949_v42 }
 0x833   :  { %v1770_v44 = vpop.f32.mrf.mxu1  ;;  %v1841_v47 = vpop.f32.mrf.mxu0 }
 0x834   :  { %v1850_v45 = vrot.slane %v1770_v44, 2  ;;  %v1852_v54 = vrot.slane %v1841_v47, 2 }
 0x835   :  { %v1772_v50 = vpop.f32.mrf.mxu1  ;;  %v1843_v59 = vpop.f32.mrf.mxu0 }
 0x836   :  { %v1858_v51 = vadd.f32 %v1850_v45, %v2965_v13  ;;  %v1851_v52 = vrot.slane %v1772_v50, 2  ;;  %v1860_v60 = vadd.f32 %v1852_v54, %v2971_v6  ;;  %v1853_v61 = vrot.slane %v1843_v59, 2 }
 0x838   :  { %v1862_v53 = vmul.f32 0.5, %v1858_v51  ;;  %v1859_v56 = vadd.f32 %v1851_v52, %v3951_v55  ;;  %v1861_v62 = vadd.f32 %v1853_v61, %v2974_v0 }
 0x83a   :  { %2371 = vtanh.f32 %v1862_v53  ;;  %v1866_v57 = vmul.f32 0.5, %v1859_v56  ;;  %v1871_v63 = vmul.f32 0.5, %v1861_v62 }
 0x83c   :  { %2373 = vtanh.f32 %v1866_v57 }
 0x83d   :  { %2375 = vtanh.f32 %v1860_v60 }
 0x83e   :  { %2377 = vtanh.f32 %v1871_v63 }
 0x847   :  { %v2372_v1 = vpop.eup %2371 }
 0x848   :  { %v1864_v2 = vmul.f32 0.5, %v2372_v1 }
 0x849   :  { %v2374_v3 = vpop.eup %2373 }
 0x84a   :  { %v1865_v11 = vadd.f32 0.5, %v1864_v2  ;;  %v1868_v9 = vmul.f32 0.5, %v2374_v3  ;;  %v2376_v48 = vpop.eup %2375 }
 0x84b   :  { %v2378_v12 = vpop.eup %2377 }
 0x84c   :  { %v1869_v4 = vadd.f32 0.5, %v1868_v9  ;;  %v1879_v18 = vmul.f32 %v2376_v48, %v1865_v11  ;;  %v1873_v10 = vmul.f32 0.5, %v2378_v12 }
 0x84e   :  { %v1878_v49 = vmul.f32 %v1876_v8, %v1869_v4  ;;  %v1874_v22 = vadd.f32 0.5, %v1873_v10 }
 0x850   :  { %v3572_v19 = vadd.f32 %v1879_v18, %v1878_v49 }
 0x852   :  { %2379 = vtanh.f32 %v3572_v19 }
 0x85f   :  { %v2380_v14 = vpop.eup %2379 }
 0x860   :  { %v1882_v15 = vmul.f32 %v2380_v14, %v1874_v22 }
 0x862   :  { %v1884_v20 = vrot.slane %v1882_v15, 6  ;;  %v3577_v5 = vsel %vm175_vm2, %v3500_v25, %v1882_v15  ;;  %v2090_v25 = vld [vmem:[%s3674_s12 + $0x58] sm:$0xff]  ;;  %s2551_s12 = smov [#allocation7]  }
 0x863   :  { %s2184_s25 = sshll.u32 %s2551_s12, 4  ;;  %s2185_s25 = int_to_ptr.vmem [resolvable:$true] %s2184_s25 }
 0x864   :  { %1951 = vmatmul.mubr.f32.vlgmr.msra.gmra.mxu1 %v1884_v20  ;;  %2022 = vmatmul.mubr.f32.vlgmr.msra.gmra.mxu0 %v1884_v20  ;;  %s2497_s26 = scalar_lea.vmem %s2185_s25, 16  ;;  %s2501_s27 = scalar_lea.vmem %s2185_s25, 32 }
 0x865   :  { %2300 = vmatprep.mubr.msk.f32.mxu1 %vm2550_vm0, %v3949_v42  ;;  %2269 = vmatpush3.msra.mxu1 %v2094_v23  ;;  %p2498_p10 = scmp.ne.s32.totalorder %s2185_s25, %s2497_s26  ;;  %p2502_p11 = scmp.lt.s32.totalorder %s2185_s25, %s2185_s25 }
 0x866   :  { %2270 = vmatprep.subr.mxu1 %v3949_v42  ;;  %p2503_p12 = scmp.lt.s32.totalorder %s2501_s27, %s2497_s26 }
 0x867   :  { %2271 = vmatpush3.msra.mxu1 %v2093_v21 }
 0x868   :  { %2272 = vmatprep.subr.mxu1 %v3949_v42  ;;  %p2504_p13 = por %p2503_p12, %p2502_p11 }
 0x869   :  { %2273 = vmatpush3.msra.mxu1 %v2092_v16 }
 0x86a   :  { %2274 = vmatprep.subr.mxu1 %v3949_v42  ;;  %p2505_p0 = pnand %p2504_p13, %p2498_p10 }
 0x86b   :  { %2275 = vmatpush3.msra.mxu1 %v2091_v46 }
 0x86c   :  { %2276 = vmatprep.subr.mxu1 %v3949_v42 }
 0x86d   :  { %2277 = vmatpush3.msra.mxu1 %v2090_v25 }
 0x86e   :  { %2278 = vmatprep.subr.mxu1 %v3949_v42 }
 0x86f   :  { %2279 = vmatpush3.msra.mxu1 %v2089_v58 }
 0x870   :  { %2280 = vmatprep.subr.mxu1 %v3949_v42 }
 0x871   :  { %2281 = vmatpush3.msra.mxu1 %v2088_v7 }
 0x872   :  { %2282 = vmatprep.subr.mxu1 %v3949_v42 }
 0x873   :  { %2283 = vmatpush3.msra.mxu1 %v2087_v24 }
 0x874   :  { %2284 = vmatprep.subr.mxu1 %v3949_v42 }
 0x875   :  { %2285 = vmatpush3.msra.mxu1 %v2086_v26 }
 0x876   :  { %2286 = vmatprep.subr.mxu1 %v3949_v42 }
 0x877   :  { %2287 = vmatpush3.msra.mxu1 %v2085_v27 }
 0x878   :  { %2288 = vmatprep.subr.mxu1 %v3949_v42 }
 0x879   :  { %2289 = vmatpush3.msra.mxu1 %v2084_v17 }
 0x87a   :  { %2290 = vmatprep.subr.mxu1 %v3949_v42 }
 0x87b   :  { %2291 = vmatpush3.msra.mxu1 %v2083_v28 }
 0x87c   :  { %2292 = vmatprep.subr.mxu1 %v3949_v42 }
 0x87d   :  { %2293 = vmatpush3.msra.mxu1 %v2082_v29 }
 0x87e   :  { %2294 = vmatprep.subr.mxu1 %v3949_v42 }
 0x87f   :  { %2295 = vmatpush3.msra.mxu1 %v2081_v30 }
 0x880   :  { %2296 = vmatprep.subr.mxu1 %v3949_v42 }
 0x881   :  { %2297 = vmatpush3.msra.mxu1 %v2080_v31 }
 0x882   :  { %2298 = vmatprep.subr.mxu1 %v3949_v42 }
 0x883   :  { %2299 = vmatpush3.msra.mxu1 %v2079_v32 }
 0x924   :  { %v1952_v33 = vpop.f32.mrf.mxu1  ;;  %v2023_v35 = vpop.f32.mrf.mxu0 }
 0x925   :  { %v2032_v34 = vrot.slane %v1952_v33, 1  ;;  %v2034_v40 = vrot.slane %v2023_v35, 1 }
 0x926   :  { %v1954_v36 = vpop.f32.mrf.mxu1  ;;  %v2025_v44 = vpop.f32.mrf.mxu0 }
 0x927   :  { %v2040_v37 = vadd.f32 %v2032_v34, %v2965_v13  ;;  %v2033_v38 = vrot.slane %v1954_v36, 1  ;;  %v2042_v45 = vadd.f32 %v2034_v40, %v2971_v6  ;;  %v2035_v47 = vrot.slane %v2025_v44, 1 }
 0x929   :  { %v2044_v39 = vmul.f32 0.5, %v2040_v37  ;;  %v2041_v41 = vadd.f32 %v2033_v38, %v3951_v55  ;;  %v2043_v42 = vadd.f32 %v2035_v47, %v2974_v0  ;;  %v2058_v55 = vrot.slane %v3572_v19, 7 }
 0x92b   :  { %2381 = vtanh.f32 %v2044_v39  ;;  %v2048_v43 = vmul.f32 0.5, %v2041_v41  ;;  %v2053_v50 = vmul.f32 0.5, %v2043_v42 }
 0x92d   :  { %2383 = vtanh.f32 %v2048_v43 }
 0x92e   :  { %2385 = vtanh.f32 %v2042_v45 }
 0x92f   :  { %2387 = vtanh.f32 %v2053_v50 }
 0x938   :  { %v2382_v51 = vpop.eup %2381 }
 0x939   :  { %v2046_v52 = vmul.f32 0.5, %v2382_v51 }
 0x93a   :  { %v2384_v53 = vpop.eup %2383 }
 0x93b   :  { %v2047_v13 = vadd.f32 0.5, %v2046_v52  ;;  %v2050_v54 = vmul.f32 0.5, %v2384_v53  ;;  %v2386_v57 = vpop.eup %2385 }
 0x93c   :  { %v2388_v6 = vpop.eup %2387 }
 0x93d   :  { %v2051_v56 = vadd.f32 0.5, %v2050_v54  ;;  %v2061_v60 = vmul.f32 %v2386_v57, %v2047_v13  ;;  %v2055_v62 = vmul.f32 0.5, %v2388_v6 }
 0x93f   :  { %v2060_v59 = vmul.f32 %v2058_v55, %v2051_v56  ;;  %v2056_v63 = vadd.f32 0.5, %v2055_v62 }
 0x941   :  { %v2062_v61 = vadd.f32 %v2061_v60, %v2060_v59 }
 0x943   :  { %2389 = vtanh.f32 %v2062_v61  ;;  %2066 = vst [vmem:[#allocation8 - $0x7] sm:$0x80] %v2062_v61 }
 0x950   :  { %v2390_v0 = vpop.eup %2389 }
 0x951   :  { %v2064_v1 = vmul.f32 %v2390_v0, %v2056_v63 }
 0x953   :  { %v2078_v2 = vsel %vm2077_vm10, %v3577_v5, %v2064_v1  ;;  %2065 = vst [vmem:[#allocation7 - $0x7] sm:$0x80] %v2064_v1 }
 0x954   :  { %2301 = vmatmul.mubr.f32.vlgmr.msra.gmra.mxu1 %v2078_v2 }
 0x955   :  { %2508 = shalt.err (!%p2505_p0)
}
 0x956   :  { %2187 = dma.vmem_to_hbm [thread:$0]  %s2185_s25, 16, %s3677_s15, [#allocation4]  }
 0x957   :  { %s2517_s30 = scalar_lea.vmem %s2195_s4, 16  ;;  %s2521_s7 = scalar_lea.vmem %s2195_s4, 32 }
 0x958   :  { %p2518_p1 = scmp.ne.s32.totalorder %s2195_s4, %s2517_s30  ;;  %p2522_p2 = scmp.lt.s32.totalorder %s2195_s4, %s2195_s4 }
 0x959   :  { %p2523_p3 = scmp.lt.s32.totalorder %s2521_s7, %s2517_s30 }
 0x95b   :  { %p2524_p4 = por %p2523_p3, %p2522_p2 }
 0x95d   :  { %p2525_p5 = pnand %p2524_p4, %p2518_p1 }
 0x95f   :  { %2528 = shalt.err (!%p2525_p5)
}
 0x960   :  { %2197 = dma.vmem_to_hbm [thread:$0]  %s2195_s4, 16, %s3678_s16, [#allocation9]   ;;  %v2217_v3 = vld [vmem:[%s3675_s13] ss:$0 sm:$0xff]  ;;  %vm2174_vm11 = vcmask 31744  }
 0xa14   :  { %v2168_v11 = vpop.f32.mrf.mxu1 }
 0xa15   :  { %v2169_v9 = vadd.f32 %v2217_v3, %v2168_v11 }
 0xa16   :  { %v2302_v4 = vpop.f32.mrf.mxu1 }
 0xa17   :  { %2391 = vtanh.f32 %v2169_v9 }
 0xa24   :  { %v2392_v8 = vpop.eup %2391 }
 0xa25   :  { %v2173_v48 = vmul.f32 0.5, %v2392_v8 }
 0xa27   :  { %2175 = vst.msk [vmem:[%s3676_s14] sm:$0xff] %vm2174_vm11, %v2173_v48 }
 0xa28   :  { %2541 = dma.done.wait [#allocation4], 16  }
 0xa29   :  { %2542 = vsyncadd [#allocation4], 4294967280 }
 0xa2a   :  { %2543 = dma.done.wait [#allocation9], 16  }
 0xa2b   :  { %2544 = vsyncadd [#allocation9], 4294967280 }
 0xa2c   :  { %2206 = vsyncpa [#allocation3], 1 }
 0xa2d   :  { %2207 = vsyncpa [#allocation6], 1 }
 0xa2e   :  { %2208 = vsyncpa [#allocation4], 1 }
 0xa2f   :  { %2209 = vsyncpa [#allocation9], 1 }

</bundles_post_ra>
